<compile_context>
chip_gen: v6e
topology: v6e:2x2x1
jax: 0.10.0
libtpu: 0.0.40
codegen_flags: <defaults>
</compile_context>

<pallas_src>
import functools
import math

import numpy as np

import jax
import jax.numpy as jnp
from jax.experimental import pallas as pl
from jax.experimental.pallas import tpu as pltpu


def _round_up(x, m):
    return (x + m - 1) // m * m


def _cdiv(a, b):
    return -(-a // b)


# ---------------------------------------------------------------------------
# Hardware-dependent knobs
# ---------------------------------------------------------------------------
_DEFAULT_LIMITS = (48 * 1024 * 1024, 36 * 1024 * 1024)


@functools.lru_cache(maxsize=None)
def _vmem_limits():
    """(vmem_limit_bytes, tile working-set budget), per TPU generation."""
    try:
        cap = int(pltpu.get_tpu_info().vmem_capacity_bytes)
    except Exception:
        return _DEFAULT_LIMITS
    if cap >= 100 * 1024 * 1024:          # v5e / v6e: 128 MiB physical VMEM
        return 100 * 1024 * 1024, 80 * 1024 * 1024
    if cap >= 60 * 1024 * 1024:           # v7x: 64 MiB physical per TensorCore
        return 52 * 1024 * 1024, 40 * 1024 * 1024
    return _DEFAULT_LIMITS


@functools.lru_cache(maxsize=None)
def _single_buffer_supported():
    """Probe pl.Buffered(1) (single-buffered resident operands) on this backend."""
    if not hasattr(pl, "Buffered"):
        return False
    try:
        def body(x_ref, o_ref):
            o_ref[...] = x_ref[...] + 1.0

        x = jnp.arange(8 * 128, dtype=jnp.float32).reshape(8, 128)
        out = pl.pallas_call(
            body,
            out_shape=jax.ShapeDtypeStruct((16, 128), jnp.float32),
            grid_spec=pltpu.PrefetchScalarGridSpec(
                num_scalar_prefetch=0,
                grid=(2,),
                in_specs=[pl.BlockSpec((8, 128), lambda i: (0, 0),
                                       pipeline_mode=pl.Buffered(1))],
                out_specs=pl.BlockSpec((8, 128), lambda i: (i, 0)),
            ),
        )(x)
        out = jax.block_until_ready(out)
        ref = jnp.concatenate([x + 1.0, x + 1.0], axis=0)
        return bool(jnp.allclose(out, ref))
    except Exception:
        return False


def _pick_tm(M, cap):
    """Pick an M tile (multiple of 8) giving an even, >=2-block parallel grid."""
    tm = min(_round_up(M, 8), cap)
    nb = _cdiv(M, tm)
    if nb < 2 or nb % 2:
        target = max(2, nb + (nb % 2))
        tm2 = _round_up(_cdiv(M, target), 8)
        if 0 < tm2 < tm and _cdiv(M, tm2) % 2 == 0:
            tm = tm2
    return tm


# ---------------------------------------------------------------------------
# Standalone LayerNorm (only used by the K-tiling fallback path)
# ---------------------------------------------------------------------------
def _layernorm_kernel(x_ref, g_ref, b_ref, o_ref, *, eps):
    x = x_ref[...].astype(jnp.float32)
    mean = jnp.mean(x, axis=-1, keepdims=True)
    xc = x - mean
    var = jnp.mean(xc * xc, axis=-1, keepdims=True)
    y = xc * jax.lax.rsqrt(var + eps)
    y = y * g_ref[...] + b_ref[...]
    o_ref[...] = y.astype(o_ref.dtype)


def _layernorm(x2d, gamma_row, beta_row, eps, out_dtype, vmem_limit):
    M, H = x2d.shape
    tm = _pick_tm(M, 512)
    m_pad = _round_up(M, tm)
    x_p = jnp.pad(x2d, ((0, m_pad - M), (0, 0))) if m_pad != M else x2d
    out = pl.pallas_call(
        functools.partial(_layernorm_kernel, eps=eps),
        out_shape=jax.ShapeDtypeStruct((m_pad, H), out_dtype),
        grid_spec=pltpu.PrefetchScalarGridSpec(
            num_scalar_prefetch=0,
            grid=(m_pad // tm,),
            in_specs=[
                pl.BlockSpec((tm, H), lambda i: (i, 0)),
                pl.BlockSpec((1, H), lambda i: (0, 0)),
                pl.BlockSpec((1, H), lambda i: (0, 0)),
            ],
            out_specs=pl.BlockSpec((tm, H), lambda i: (i, 0)),
        ),
        compiler_params=pltpu.CompilerParams(
            dimension_semantics=("parallel",),
            vmem_limit_bytes=vmem_limit,
        ),
    )(x_p, gamma_row, beta_row)
    return out[:M] if m_pad != M else out


# ---------------------------------------------------------------------------
# Fused linear kernel: out = act([LN](x) @ w_t + b) (+ residual)
# ---------------------------------------------------------------------------
def _make_linear_kernel(activation, has_residual, has_ln, use_acc, eps):
    def kernel(*refs):
        if use_acc:
            acc_ref = refs[-1]
            refs = refs[:-1]
        else:
            acc_ref = None
        it = iter(refs)
        x_ref = next(it)
        w_ref = next(it)
        b_ref = next(it)
        g_ref = next(it) if has_ln else None
        be_ref = next(it) if has_ln else None
        r_ref = next(it) if has_residual else None
        o_ref = next(it)

        if has_ln:
            # LayerNorm prologue: f32 VPU math, bf16 (MXU-native) matmul operand.
            xv = x_ref[...].astype(jnp.float32)
            mu = jnp.mean(xv, axis=-1, keepdims=True)
            xc = xv - mu
            var = jnp.mean(xc * xc, axis=-1, keepdims=True)
            xn = xc * jax.lax.rsqrt(var + eps)
            xn = xn * g_ref[...] + be_ref[...]
            x_op = xn.astype(w_ref.dtype)
        else:
            x_op = x_ref[...]

        def finish(acc):
            y = acc + b_ref[...].astype(jnp.float32)
            if activation == "gelu":
                # TODO(synk): HF ViT's default act is exact (erf) GELU; the tanh
                # approximation is used here (sub-1e-3 difference).
                y = jax.nn.gelu(y, approximate=True)
            if has_residual:
                y = y + r_ref[...].astype(jnp.float32)
            o_ref[...] = y.astype(o_ref.dtype)

        if acc_ref is None:
            # Full-K tile: one MXU pass per output tile, no accumulator scratch.
            finish(jnp.dot(x_op, w_ref[...], preferred_element_type=jnp.float32))
        else:
            k = pl.program_id(2)

            @pl.when(k == 0)
            def _():
                acc_ref[...] = jnp.zeros_like(acc_ref)

            acc_ref[...] += jnp.dot(x_op, w_ref[...],
                                    preferred_element_type=jnp.float32)

            @pl.when(k == pl.num_programs(2) - 1)
            def _():
                finish(acc_ref[...])

    return kernel


def _plan_linear_tiles(M, K, N_pad, in_itemsize, out_itemsize, has_residual,
                       budget, allow_single_buffer):
    """Large lane-dense tiles; full K (no reduction axis) when it fits VMEM."""
    tm = _pick_tm(M, 512 if budget >= 64 * 1024 * 1024 else 256)

    def usage(tk, tn, acc, weight_copies):
        u = 2 * tm * tk * in_itemsize              # x tiles (double-buffered)
        u += weight_copies * tk * tn * in_itemsize  # weight tiles
        u += weight_copies * tn * in_itemsize       # bias
        u += 2 * tm * tn * out_itemsize             # output tiles
        u += 4 * tk * 4                             # LN gamma/beta (negligible)
        if has_residual:
            u += 2 * tm * tn * in_itemsize
        if acc:
            u += tm * tn * 4                        # f32 accumulator scratch
        return u

    # Preferred: full contraction dim + widest N tile (weight stays resident).
    n_candidates = [N_pad] + [t for t in (4096, 2048, 1024, 512, 256, 128)
                              if t < N_pad and N_pad % t == 0]
    for tn in n_candidates:
        single = allow_single_buffer and tn == N_pad
        if usage(K, tn, False, 1 if single else 2) <= budget:
            return tm, K, tn, single
    # Fallback (not reachable for ViT-sized layers): tile the contraction dim.
    tn_fb = 256 if N_pad % 256 == 0 else 128
    for tk in (2048, 1024, 512, 256, 128):
        if usage(tk, tn_fb, True, 2) <= budget:
            return tm, tk, tn_fb, False
    return tm, 128, 128, False


def _linear(x2d, w_t, b_row, *, ln=None, residual=None, activation=None,
            out_dtype, n_out, eps, vmem_limit, vmem_budget,
            allow_single_buffer):
    """act([LN](x2d) @ w_t + b)(+ residual), sliced to [M, n_out].

    w_t: pre-transposed, lane-padded weight [K, N_pad]; b_row: [1, N_pad];
    ln (optional): (gamma_row[1,K] f32, beta_row[1,K] f32); residual: [M, *].
    """
    M, K = x2d.shape
    kw, N_pad = w_t.shape
    assert kw == K, (kw, K)
    in_itemsize = np.dtype(x2d.dtype).itemsize
    out_itemsize = np.dtype(out_dtype).itemsize

    tm, tk, tn, single_buf = _plan_linear_tiles(
        M, K, N_pad, in_itemsize, out_itemsize, residual is not None,
        vmem_budget, allow_single_buffer)
    nk = _cdiv(K, tk)

    if nk > 1 and ln is not None:
        # K-tiling fallback cannot fuse LayerNorm (needs full rows).
        x2d = _layernorm(x2d, ln[0], ln[1], eps, x2d.dtype, vmem_limit)
        ln = None

    m_pad = _round_up(M, tm)
    k_pad = _round_up(K, tk)
    n_tot = _round_up(N_pad, tn)

    x_p = x2d
    if m_pad != M or k_pad != K:
        x_p = jnp.pad(x_p, ((0, m_pad - M), (0, k_pad - K)))
    w_p = w_t
    if k_pad != K or n_tot != N_pad:
        w_p = jnp.pad(w_p, ((0, k_pad - K), (0, n_tot - N_pad)))
    b_p = b_row
    if n_tot != N_pad:
        b_p = jnp.pad(b_p, ((0, 0), (0, n_tot - N_pad)))

    def resident(shape, index_map):
        # Constant-index operands: single-buffer them when supported.
        if single_buf:
            return pl.BlockSpec(shape, index_map, pipeline_mode=pl.Buffered(1))
        return pl.BlockSpec(shape, index_map)

    in_specs = [
        pl.BlockSpec((tm, tk), lambda i, j, k: (i, k)),
        resident((tk, tn), lambda i, j, k: (k, j)),
        resident((1, tn), lambda i, j, k: (0, j)),
    ]
    inputs = [x_p, w_p, b_p]
    if ln is not None:
        in_specs.append(resident((1, K), lambda i, j, k: (0, 0)))
        in_specs.append(resident((1, K), lambda i, j, k: (0, 0)))
        inputs.extend([ln[0], ln[1]])
    if residual is not None:
        pad_r, pad_c = m_pad - M, n_tot - residual.shape[1]
        r_p = residual if (pad_r == 0 and pad_c == 0) else jnp.pad(
            residual, ((0, pad_r), (0, pad_c)))
        in_specs.append(pl.BlockSpec((tm, tn), lambda i, j, k: (i, j)))
        inputs.append(r_p)

    out = pl.pallas_call(
        _make_linear_kernel(activation, residual is not None, ln is not None,
                            nk > 1, eps),
        out_shape=jax.ShapeDtypeStruct((m_pad, n_tot), out_dtype),
        grid_spec=pltpu.PrefetchScalarGridSpec(
            num_scalar_prefetch=0,
            grid=(m_pad // tm, n_tot // tn, nk),
            in_specs=in_specs,
            out_specs=pl.BlockSpec((tm, tn), lambda i, j, k: (i, j)),
            scratch_shapes=((pltpu.VMEM((tm, tn), jnp.float32),)
                            if nk > 1 else ()),
        ),
        compiler_params=pltpu.CompilerParams(
            dimension_semantics=("parallel", "parallel", "arbitrary"),
            vmem_limit_bytes=vmem_limit,
        ),
    )(*inputs)
    return out[:M, :n_out]


# ---------------------------------------------------------------------------
# Per-batch-element self-attention kernel (all heads per grid step)
# ---------------------------------------------------------------------------
def _attention_kernel(q_ref, k_ref, v_ref, o_ref, *, num_heads, head_dim,
                      approx_recip):
    # Heads are sliced straight out of the fused, section-padded QKV activation
    # (no XLA head split/merge transposes). 1/sqrt(dH) is folded into Wq/bq.
    for h in range(num_heads):
        lo, hi = h * head_dim, (h + 1) * head_dim
        q = q_ref[0, :, lo:hi]                          # (S, dH), MXU-native dtype
        k = k_ref[0, :, lo:hi]
        v = v_ref[0, :, lo:hi]
        s = jnp.dot(q, k.T, preferred_element_type=jnp.float32)   # (S, S) f32
        s = s - jnp.max(s, axis=-1, keepdims=True)
        p = jnp.exp(s)
        denom = jnp.sum(p, axis=-1, keepdims=True)
        p = p * pl.reciprocal(denom, approx=approx_recip)          # EUP divide
        ctx = jnp.dot(p.astype(v.dtype), v, preferred_element_type=jnp.float32)
        o_ref[0, :, lo:hi] = ctx.astype(o_ref.dtype)


def _attention(qkv3, *, sec, hidden, num_heads, head_dim, out_dtype,
               vmem_limit):
    B, S, _ = qkv3.shape
    q_spec = pl.BlockSpec((1, S, sec), lambda b: (b, 0, 0))
    k_spec = pl.BlockSpec((1, S, sec), lambda b: (b, 0, 1))
    v_spec = pl.BlockSpec((1, S, sec), lambda b: (b, 0, 2))
    return pl.pallas_call(
        functools.partial(
            _attention_kernel,
            num_heads=num_heads,
            head_dim=head_dim,
            approx_recip=np.dtype(out_dtype) != np.dtype(jnp.float32)),
        out_shape=jax.ShapeDtypeStruct((B, S, hidden), out_dtype),
        grid_spec=pltpu.PrefetchScalarGridSpec(
            num_scalar_prefetch=0,
            grid=(B,),
            in_specs=[q_spec, k_spec, v_spec],
            out_specs=pl.BlockSpec((1, S, hidden), lambda b: (b, 0, 0)),
        ),
        compiler_params=pltpu.CompilerParams(
            dimension_semantics=("parallel",),
            vmem_limit_bytes=vmem_limit,
        ),
    )(qkv3, qkv3, qkv3)


# ---------------------------------------------------------------------------
# Full encoder-layer forward (jitted once per instance) — 5 pallas_calls total
# ---------------------------------------------------------------------------
def _vit_layer_forward(params, x, *, num_heads, head_dim, sec, eps,
                       compute_dtype, vmem_limit, vmem_budget, single_buffer):
    in_dtype = x.dtype
    B, S, H = x.shape
    M = B * S
    x2d = x.reshape(M, H).astype(compute_dtype)

    lin = functools.partial(_linear, out_dtype=compute_dtype, eps=eps,
                            vmem_limit=vmem_limit, vmem_budget=vmem_budget,
                            allow_single_buffer=single_buffer)

    # 1) LN_before fused into the packed QKV projection (Wq pre-scaled).
    qkv = lin(x2d, params["w_qkv_t"], params["b_qkv"],
              ln=(params["ln1_g"], params["ln1_b"]), n_out=3 * sec)
    # 2) attention, heads indexed straight off the packed QKV activation.
    ctx = _attention(qkv.reshape(B, S, 3 * sec), sec=sec, hidden=H,
                     num_heads=num_heads, head_dim=head_dim,
                     out_dtype=compute_dtype, vmem_limit=vmem_limit)
    # 3) output projection + residual(x).
    attn_out = lin(ctx.reshape(M, H), params["wo_t"], params["bo"],
                   residual=x2d, n_out=H)
    # 4) LN_after fused into the MLP up-projection, GELU in the epilogue.
    inter = lin(attn_out, params["wi_t"], params["bi"],
                ln=(params["ln2_g"], params["ln2_b"]), activation="gelu",
                n_out=params["wi_t"].shape[1])
    # 5) MLP down-projection + residual(attn_out).
    out = lin(inter, params["wout_t"], params["bout"], residual=attn_out,
              n_out=H)
    return out.reshape(B, S, H).astype(in_dtype)


def _prep_linear(w, b, compute_dtype, pad_in_to=None):
    """PyTorch-layout weight [out, in] -> transposed, lane-padded [in, out_pad].

    Done ONCE at construction time (never per forward call)."""
    out_dim, in_dim = w.shape
    w_t = jnp.asarray(w, jnp.float32).T.astype(compute_dtype)     # [in, out]
    b_row = jnp.asarray(b, jnp.float32).reshape(1, out_dim).astype(compute_dtype)
    n_pad = _round_up(out_dim, 128)                               # lane-dense stores
    if n_pad != out_dim:
        w_t = jnp.pad(w_t, ((0, 0), (0, n_pad - out_dim)))
        b_row = jnp.pad(b_row, ((0, 0), (0, n_pad - out_dim)))
    if pad_in_to is not None and pad_in_to > in_dim:
        w_t = jnp.pad(w_t, ((0, pad_in_to - in_dim), (0, 0)))
    return w_t, b_row


class ViTLayersPallas:
    """Pallas-TPU implementation of `ViTLayers_` (one HF ViT encoder layer).

    Default compute dtype is bfloat16 (MXU-native operands, f32 accumulation
    and f32 VPU/EUP math); pass compute_dtype=jnp.float32 for a bit-accurate
    reference-grade path.
    """

    def __init__(self, raw_params, num_heads, layer_norm_eps=1e-12,
                 compute_dtype=jnp.bfloat16):
        p = {k: jnp.asarray(v) for k, v in raw_params.items()}
        cd = np.dtype(compute_dtype)
        H = p["wq"].shape[1]
        num_heads = int(num_heads)
        dH = H // num_heads
        sec = _round_up(H, 128)               # per-section (q/k/v) lane padding
        inter_pad = _round_up(p["wi"].shape[0], 128)
        scale = 1.0 / math.sqrt(dH)

        def pad_section(w, b, s=1.0):         # [H, H] / [H] -> padded to sec rows
            w = (jnp.asarray(w, jnp.float32) * s).astype(cd)
            b = (jnp.asarray(b, jnp.float32) * s).astype(cd)
            if sec != H:
                w = jnp.pad(w, ((0, sec - H), (0, 0)))
                b = jnp.pad(b, (0, sec - H))
            return w, b

        # Fold 1/sqrt(dH) into the Q projection; pack q/k/v into one weight
        # whose output sections each start at a multiple of 128 lanes.
        wq, bq = pad_section(p["wq"], p["bq"], scale)
        wk, bk = pad_section(p["wk"], p["bk"])
        wv, bv = pad_section(p["wv"], p["bv"])
        w_qkv = jnp.concatenate([wq, wk, wv], axis=0)              # [3*sec, H]
        b_qkv = jnp.concatenate([bq, bk, bv], axis=0)

        prepared = {
            "w_qkv_t": w_qkv.T,                                     # [H, 3*sec]
            "b_qkv": b_qkv.reshape(1, 3 * sec),
        }
        prepared["wo_t"], prepared["bo"] = _prep_linear(p["wo"], p["bo"], cd)
        prepared["wi_t"], prepared["bi"] = _prep_linear(p["wi"], p["bi"], cd)
        prepared["wout_t"], prepared["bout"] = _prep_linear(
            p["wout"], p["bout"], cd, pad_in_to=inter_pad)
        for name in ("ln1_g", "ln1_b", "ln2_g", "ln2_b"):           # f32 LN params
            prepared[name] = jnp.asarray(p[name], jnp.float32).reshape(1, H)
        self.params = prepared

        vmem_limit, vmem_budget = _vmem_limits()
        single_buffer = _single_buffer_supported()

        self._fwd = jax.jit(functools.partial(
            _vit_layer_forward,
            num_heads=num_heads,
            head_dim=dH,
            sec=sec,
            eps=float(layer_norm_eps),
            compute_dtype=cd,
            vmem_limit=vmem_limit,
            vmem_budget=vmem_budget,
            single_buffer=single_buffer,
        ))

    def __call__(self, hidden_states, labels=None, position_ids=None,
                 attention_mask=None):
        # TODO(synk): HF ViTLayer's second argument is a per-head mask
        # (head_mask); galvatron passes None, so masking is not implemented.
        return self._fwd(self.params, hidden_states)


# ---------------------------------------------------------------------------
# Pure-JAX reference for the correctness check
# ---------------------------------------------------------------------------
def _reference_vit_layer(params, x, num_heads, eps):
    def ln(t, g, b):
        mu = t.mean(-1, keepdims=True)
        var = ((t - mu) ** 2).mean(-1, keepdims=True)
        return (t - mu) * jax.lax.rsqrt(var + eps) * g + b

    B, S, H = x.shape
    dH = H // num_heads
    h = ln(x, params["ln1_g"], params["ln1_b"])
    q = h @ params["wq"].T + params["bq"]
    k = h @ params["wk"].T + params["bk"]
    v = h @ params["wv"].T + params["bv"]

    def heads(t):
        return t.reshape(B, S, num_heads, dH).transpose(0, 2, 1, 3)

    s = jnp.einsum("bhqd,bhkd->bhqk", heads(q), heads(k)) / math.sqrt(dH)
    p = jax.nn.softmax(s, axis=-1)
    ctx = jnp.einsum("bhqk,bhkd->bhqd", p, heads(v))
    ctx = ctx.transpose(0, 2, 1, 3).reshape(B, S, H)
    attn_out = ctx @ params["wo"].T + params["bo"] + x
    h2 = ln(attn_out, params["ln2_g"], params["ln2_b"])
    inter = jax.nn.gelu(h2 @ params["wi"].T + params["bi"], approximate=True)
    return inter @ params["wout"].T + params["bout"] + attn_out


if __name__ == "__main__":
    batch, seq, hidden, num_heads = 2, 8, 32, 2
    intermediate = 4 * hidden

    keys = jax.random.split(jax.random.PRNGKey(0), 17)

    def rand(k, shape, scale=0.1):
        return scale * jax.random.normal(k, shape, dtype=jnp.float32)

    raw = dict(
        ln1_g=1.0 + rand(keys[0], (hidden,)), ln1_b=rand(keys[1], (hidden,)),
        wq=rand(keys[2], (hidden, hidden)), bq=rand(keys[3], (hidden,)),
        wk=rand(keys[4], (hidden, hidden)), bk=rand(keys[5], (hidden,)),
        wv=rand(keys[6], (hidden, hidden)), bv=rand(keys[7], (hidden,)),
        wo=rand(keys[8], (hidden, hidden)), bo=rand(keys[9], (hidden,)),
        ln2_g=1.0 + rand(keys[10], (hidden,)), ln2_b=rand(keys[11], (hidden,)),
        wi=rand(keys[12], (intermediate, hidden)), bi=rand(keys[13], (intermediate,)),
        wout=rand(keys[14], (hidden, intermediate)), bout=rand(keys[15], (hidden,)),
    )
    hidden_states = jax.random.normal(keys[16], (batch, seq, hidden),
                                      dtype=jnp.float32)

    with jax.default_matmul_precision("highest"):
        ref = jax.block_until_ready(
            _reference_vit_layer(raw, hidden_states, num_heads, 1e-12))

    # Default (recommended) path: bf16 MXU operands, f32 accumulation — loose check.
    model = ViTLayersPallas(raw, num_heads=num_heads)
    out = jax.block_until_ready(model(hidden_states))
    assert out.shape == (batch, seq, hidden)
    assert out.dtype == hidden_states.dtype
    assert jnp.allclose(out, ref, atol=1e-1, rtol=1e-1), (
        float(jnp.max(jnp.abs(out - ref))))

    # float32 compute path — tight correctness check.
    model_f32 = ViTLayersPallas(raw, num_heads=num_heads,
                                compute_dtype=jnp.float32)
    out_f32 = jax.block_until_ready(model_f32(hidden_states))
    assert out_f32.shape == (batch, seq, hidden)
    assert jnp.allclose(out_f32, ref, atol=5e-4, rtol=5e-4), (
        float(jnp.max(jnp.abs(out_f32 - ref))))

    print("KERNEL_OK")
</pallas_src>

<mosaic_0001>
module attributes {stable_mosaic.version = 11 : i64} {
  func.func @body(%arg0: i32, %arg1: memref<8x128xf32, #tpu.memory_space<vmem>>, %arg2: memref<8x128xf32, #tpu.memory_space<vmem>>) attributes {dimension_semantics = [#tpu.dimension_semantics<arbitrary>], iteration_bounds = array<i64: 2>, scalar_prefetch = 0 : i64, scratch_operands = 0 : i64, tpu.core_type = #tpu.core_type<tc>, window_params = [{pipeline_mode = #tpu.pipeline_mode<synchronous>, transform_indices = @transform_0, window_bounds = array<i64: 8, 128>}, {transform_indices = @transform_1, window_bounds = array<i64: 8, 128>}]} {
    %c0 = arith.constant 0 : index
    %c0_0 = arith.constant 0 : index
    %0 = vector.load %arg1[%c0, %c0_0] : memref<8x128xf32, #tpu.memory_space<vmem>>, vector<8x128xf32>
    %cst = arith.constant 1.000000e+00 : f32
    %1 = vector.broadcast %cst : f32 to vector<8x128xf32>
    %2 = arith.addf %0, %1 : vector<8x128xf32>
    %c0_1 = arith.constant 0 : index
    %c0_2 = arith.constant 0 : index
    %3 = vector.load %arg2[%c0_1, %c0_2] : memref<8x128xf32, #tpu.memory_space<vmem>>, vector<8x128xf32>
    tpu.vector_store %arg2[%c0_1, %c0_2], %2 {strides = array<i32>} : memref<8x128xf32, #tpu.memory_space<vmem>>, vector<8x128xf32>,
    return
  }
  func.func @transform_0(%arg0: i32) -> (i32, i32) {
    %c0_i32 = arith.constant 0 : i32
    %c0_i32_0 = arith.constant 0 : i32
    %c0_i32_1 = arith.constant 0 : i32
    return %c0_i32, %c0_i32_0 : i32, i32
  }
  func.func @transform_1(%arg0: i32) -> (i32, i32) {
    %c0_i32 = arith.constant 0 : i32
    %c0_i32_0 = arith.constant 0 : i32
    return %arg0, %c0_i32 : i32, i32
  }
}

module attributes {stable_mosaic.version = 11 : i64} {
  func.func @_attention_kernel(%arg0: i32, %arg1: memref<1x8x128xbf16, #tpu.memory_space<vmem>>, %arg2: memref<1x8x128xbf16, #tpu.memory_space<vmem>>, %arg3: memref<1x8x128xbf16, #tpu.memory_space<vmem>>, %arg4: memref<1x8x32xbf16, #tpu.memory_space<vmem>>) attributes {dimension_semantics = [#tpu.dimension_semantics<parallel>], iteration_bounds = array<i64: 2>, scalar_prefetch = 0 : i64, scratch_operands = 0 : i64, tpu.core_type = #tpu.core_type<tc>, window_params = [{transform_indices = @transform_0, window_bounds = array<i64: 1, 8, 128>}, {transform_indices = @transform_1, window_bounds = array<i64: 1, 8, 128>}, {transform_indices = @transform_2, window_bounds = array<i64: 1, 8, 128>}, {transform_indices = @transform_3, window_bounds = array<i64: 1, 8, 32>}]} {
    %c0 = arith.constant 0 : index
    %c0_0 = arith.constant 0 : index
    %c0_1 = arith.constant 0 : index
    %0 = vector.load %arg1[%c0, %c0_0, %c0_1] : memref<1x8x128xbf16, #tpu.memory_space<vmem>>, vector<1x8x16xbf16>
    %1 = vector.shape_cast %0 : vector<1x8x16xbf16> to vector<8x16xbf16>
    %c0_2 = arith.constant 0 : index
    %c0_3 = arith.constant 0 : index
    %c0_4 = arith.constant 0 : index
    %2 = vector.load %arg2[%c0_2, %c0_3, %c0_4] : memref<1x8x128xbf16, #tpu.memory_space<vmem>>, vector<1x8x16xbf16>
    %3 = vector.shape_cast %2 : vector<1x8x16xbf16> to vector<8x16xbf16>
    %c0_5 = arith.constant 0 : index
    %c0_6 = arith.constant 0 : index
    %c0_7 = arith.constant 0 : index
    %4 = vector.load %arg3[%c0_5, %c0_6, %c0_7] : memref<1x8x128xbf16, #tpu.memory_space<vmem>>, vector<1x8x16xbf16>
    %5 = vector.shape_cast %4 : vector<1x8x16xbf16> to vector<8x16xbf16>
    %6 = tpu.transpose %3, [1, 0] : vector<8x16xbf16> -> vector<16x8xbf16>
    %cst = arith.constant dense<0.000000e+00> : vector<8x8xf32>
    %7 = tpu.matmul %1, %6, %cst {dimension_numbers = #tpu.dot_dimension_numbers<[1], [0], [0], [1], [0, 0, 1, 1], [], []>} : vector<8x16xbf16>, vector<16x8xbf16>, vector<8x8xf32> -> vector<8x8xf32>
    %cst_8 = arith.constant dense<0xFF800000> : vector<8xf32>
    %8 = vector.multi_reduction <maximumf>, %7, %cst_8 [1] : vector<8x8xf32> to vector<8xf32>
    %9 = vector.shape_cast %8 : vector<8xf32> to vector<8x1xf32>
    %10 = vector.broadcast %9 : vector<8x1xf32> to vector<8x8xf32>
    %11 = arith.subf %7, %10 : vector<8x8xf32>
    %12 = math.exp %11 : vector<8x8xf32>
    %cst_9 = arith.constant dense<0.000000e+00> : vector<8xf32>
    %13 = vector.multi_reduction <add>, %12, %cst_9 [1] : vector<8x8xf32> to vector<8xf32>
    %14 = vector.shape_cast %13 : vector<8xf32> to vector<8x1xf32>
    %15 = tpu.reciprocal %14 {approx = true} : vector<8x1xf32> -> vector<8x1xf32>
    %16 = vector.broadcast %15 : vector<8x1xf32> to vector<8x8xf32>
    %17 = arith.mulf %12, %16 : vector<8x8xf32>
    %18 = arith.truncf %17 : vector<8x8xf32> to vector<8x8xbf16>
    %cst_10 = arith.constant dense<0.000000e+00> : vector<8x16xf32>
    %19 = tpu.matmul %18, %5, %cst_10 {dimension_numbers = #tpu.dot_dimension_numbers<[1], [0], [0], [1], [0, 0, 1, 1], [], []>} : vector<8x8xbf16>, vector<8x16xbf16>, vector<8x16xf32> -> vector<8x16xf32>
    %20 = arith.truncf %19 : vector<8x16xf32> to vector<8x16xbf16>
    %c0_11 = arith.constant 0 : index
    %c0_12 = arith.constant 0 : index
    %c0_13 = arith.constant 0 : index
    %21 = vector.load %arg4[%c0_11, %c0_12, %c0_13] : memref<1x8x32xbf16, #tpu.memory_space<vmem>>, vector<1x8x16xbf16>
    %22 = vector.shape_cast %21 : vector<1x8x16xbf16> to vector<8x16xbf16>
    %23 = vector.shape_cast %20 : vector<8x16xbf16> to vector<1x8x16xbf16>
    tpu.vector_store %arg4[%c0_11, %c0_12, %c0_13], %23 {strides = array<i32>} : memref<1x8x32xbf16, #tpu.memory_space<vmem>>, vector<1x8x16xbf16>,
    %c0_14 = arith.constant 0 : index
    %c0_15 = arith.constant 0 : index
    %c16 = arith.constant 16 : index
    %24 = vector.load %arg1[%c0_14, %c0_15, %c16] : memref<1x8x128xbf16, #tpu.memory_space<vmem>>, vector<1x8x16xbf16>
    %25 = vector.shape_cast %24 : vector<1x8x16xbf16> to vector<8x16xbf16>
    %c0_16 = arith.constant 0 : index
    %c0_17 = arith.constant 0 : index
    %c16_18 = arith.constant 16 : index
    %26 = vector.load %arg2[%c0_16, %c0_17, %c16_18] : memref<1x8x128xbf16, #tpu.memory_space<vmem>>, vector<1x8x16xbf16>
    %27 = vector.shape_cast %26 : vector<1x8x16xbf16> to vector<8x16xbf16>
    %c0_19 = arith.constant 0 : index
    %c0_20 = arith.constant 0 : index
    %c16_21 = arith.constant 16 : index
    %28 = vector.load %arg3[%c0_19, %c0_20, %c16_21] : memref<1x8x128xbf16, #tpu.memory_space<vmem>>, vector<1x8x16xbf16>
    %29 = vector.shape_cast %28 : vector<1x8x16xbf16> to vector<8x16xbf16>
    %30 = tpu.transpose %27, [1, 0] : vector<8x16xbf16> -> vector<16x8xbf16>
    %cst_22 = arith.constant dense<0.000000e+00> : vector<8x8xf32>
    %31 = tpu.matmul %25, %30, %cst_22 {dimension_numbers = #tpu.dot_dimension_numbers<[1], [0], [0], [1], [0, 0, 1, 1], [], []>} : vector<8x16xbf16>, vector<16x8xbf16>, vector<8x8xf32> -> vector<8x8xf32>
    %cst_23 = arith.constant dense<0xFF800000> : vector<8xf32>
    %32 = vector.multi_reduction <maximumf>, %31, %cst_23 [1] : vector<8x8xf32> to vector<8xf32>
    %33 = vector.shape_cast %32 : vector<8xf32> to vector<8x1xf32>
    %34 = vector.broadcast %33 : vector<8x1xf32> to vector<8x8xf32>
    %35 = arith.subf %31, %34 : vector<8x8xf32>
    %36 = math.exp %35 : vector<8x8xf32>
    %cst_24 = arith.constant dense<0.000000e+00> : vector<8xf32>
    %37 = vector.multi_reduction <add>, %36, %cst_24 [1] : vector<8x8xf32> to vector<8xf32>
    %38 = vector.shape_cast %37 : vector<8xf32> to vector<8x1xf32>
    %39 = tpu.reciprocal %38 {approx = true} : vector<8x1xf32> -> vector<8x1xf32>
    %40 = vector.broadcast %39 : vector<8x1xf32> to vector<8x8xf32>
    %41 = arith.mulf %36, %40 : vector<8x8xf32>
    %42 = arith.truncf %41 : vector<8x8xf32> to vector<8x8xbf16>
    %cst_25 = arith.constant dense<0.000000e+00> : vector<8x16xf32>
    %43 = tpu.matmul %42, %29, %cst_25 {dimension_numbers = #tpu.dot_dimension_numbers<[1], [0], [0], [1], [0, 0, 1, 1], [], []>} : vector<8x8xbf16>, vector<8x16xbf16>, vector<8x16xf32> -> vector<8x16xf32>
    %44 = arith.truncf %43 : vector<8x16xf32> to vector<8x16xbf16>
    %c0_26 = arith.constant 0 : index
    %c0_27 = arith.constant 0 : index
    %c16_28 = arith.constant 16 : index
    %45 = vector.load %arg4[%c0_26, %c0_27, %c16_28] : memref<1x8x32xbf16, #tpu.memory_space<vmem>>, vector<1x8x16xbf16>
    %46 = vector.shape_cast %45 : vector<1x8x16xbf16> to vector<8x16xbf16>
    %47 = vector.shape_cast %44 : vector<8x16xbf16> to vector<1x8x16xbf16>
    tpu.vector_store %arg4[%c0_26, %c0_27, %c16_28], %47 {strides = array<i32>} : memref<1x8x32xbf16, #tpu.memory_space<vmem>>, vector<1x8x16xbf16>,
    return
  }
  func.func @transform_0(%arg0: i32) -> (i32, i32, i32) {
    %c0_i32 = arith.constant 0 : i32
    %c0_i32_0 = arith.constant 0 : i32
    %c0_i32_1 = arith.constant 0 : i32
    return %arg0, %c0_i32, %c0_i32_0 : i32, i32, i32
  }
  func.func @transform_1(%arg0: i32) -> (i32, i32, i32) {
    %c0_i32 = arith.constant 0 : i32
    %c1_i32 = arith.constant 1 : i32
    %c0_i32_0 = arith.constant 0 : i32
    return %arg0, %c0_i32, %c1_i32 : i32, i32, i32
  }
  func.func @transform_2(%arg0: i32) -> (i32, i32, i32) {
    %c0_i32 = arith.constant 0 : i32
    %c2_i32 = arith.constant 2 : i32
    %c0_i32_0 = arith.constant 0 : i32
    return %arg0, %c0_i32, %c2_i32 : i32, i32, i32
  }
  func.func @transform_3(%arg0: i32) -> (i32, i32, i32) {
    %c0_i32 = arith.constant 0 : i32
    %c0_i32_0 = arith.constant 0 : i32
    %c0_i32_1 = arith.constant 0 : i32
    return %arg0, %c0_i32, %c0_i32_0 : i32, i32, i32
  }
}

module attributes {stable_mosaic.version = 11 : i64} {
  func.func @kernel(%arg0: i32, %arg1: i32, %arg2: i32, %arg3: memref<8x32xbf16, #tpu.memory_space<vmem>>, %arg4: memref<32x384xbf16, #tpu.memory_space<vmem>>, %arg5: memref<1x384xbf16, #tpu.memory_space<vmem>>, %arg6: memref<1x32xf32, #tpu.memory_space<vmem>>, %arg7: memref<1x32xf32, #tpu.memory_space<vmem>>, %arg8: memref<8x384xbf16, #tpu.memory_space<vmem>>) attributes {dimension_semantics = [#tpu.dimension_semantics<parallel>, #tpu.dimension_semantics<parallel>, #tpu.dimension_semantics<arbitrary>], iteration_bounds = array<i64: 2, 1, 1>, scalar_prefetch = 0 : i64, scratch_operands = 0 : i64, tpu.core_type = #tpu.core_type<tc>, window_params = [{transform_indices = @transform_0, window_bounds = array<i64: 8, 32>}, {transform_indices = @transform_1, window_bounds = array<i64: 32, 384>}, {transform_indices = @transform_2, window_bounds = array<i64: 1, 384>}, {pipeline_mode = #tpu.pipeline_mode<synchronous>, transform_indices = @transform_3, window_bounds = array<i64: 1, 32>}, {pipeline_mode = #tpu.pipeline_mode<synchronous>, transform_indices = @transform_4, window_bounds = array<i64: 1, 32>}, {transform_indices = @transform_5, window_bounds = array<i64: 8, 384>}]} {
    %c0 = arith.constant 0 : index
    %c0_0 = arith.constant 0 : index
    %0 = vector.load %arg3[%c0, %c0_0] : memref<8x32xbf16, #tpu.memory_space<vmem>>, vector<8x32xbf16>
    %1 = arith.extf %0 : vector<8x32xbf16> to vector<8x32xf32>
    %cst = arith.constant dense<0.000000e+00> : vector<8xf32>
    %2 = vector.multi_reduction <add>, %1, %cst [1] : vector<8x32xf32> to vector<8xf32>
    %3 = vector.shape_cast %2 : vector<8xf32> to vector<8x1xf32>
    %cst_1 = arith.constant 3.200000e+01 : f32
    %4 = vector.broadcast %cst_1 : f32 to vector<8x1xf32>
    %5 = arith.divf %3, %4 : vector<8x1xf32>
    %6 = vector.broadcast %5 : vector<8x1xf32> to vector<8x32xf32>
    %7 = arith.subf %1, %6 : vector<8x32xf32>
    %8 = arith.mulf %7, %7 : vector<8x32xf32>
    %cst_2 = arith.constant dense<0.000000e+00> : vector<8xf32>
    %9 = vector.multi_reduction <add>, %8, %cst_2 [1] : vector<8x32xf32> to vector<8xf32>
    %10 = vector.shape_cast %9 : vector<8xf32> to vector<8x1xf32>
    %cst_3 = arith.constant 3.200000e+01 : f32
    %11 = vector.broadcast %cst_3 : f32 to vector<8x1xf32>
    %12 = arith.divf %10, %11 : vector<8x1xf32>
    %cst_4 = arith.constant 9.99999996E-13 : f32
    %13 = vector.broadcast %cst_4 : f32 to vector<8x1xf32>
    %14 = arith.addf %12, %13 : vector<8x1xf32>
    %15 = math.rsqrt %14 : vector<8x1xf32>
    %16 = vector.broadcast %15 : vector<8x1xf32> to vector<8x32xf32>
    %17 = arith.mulf %7, %16 : vector<8x32xf32>
    %c0_5 = arith.constant 0 : index
    %c0_6 = arith.constant 0 : index
    %18 = vector.load %arg6[%c0_5, %c0_6] : memref<1x32xf32, #tpu.memory_space<vmem>>, vector<1x32xf32>
    %19 = vector.broadcast %18 : vector<1x32xf32> to vector<8x32xf32>
    %20 = arith.mulf %17, %19 : vector<8x32xf32>
    %c0_7 = arith.constant 0 : index
    %c0_8 = arith.constant 0 : index
    %21 = vector.load %arg7[%c0_7, %c0_8] : memref<1x32xf32, #tpu.memory_space<vmem>>, vector<1x32xf32>
    %22 = vector.broadcast %21 : vector<1x32xf32> to vector<8x32xf32>
    %23 = arith.addf %20, %22 : vector<8x32xf32>
    %24 = arith.truncf %23 : vector<8x32xf32> to vector<8x32xbf16>
    %c0_9 = arith.constant 0 : index
    %c0_10 = arith.constant 0 : index
    %25 = vector.load %arg4[%c0_9, %c0_10] : memref<32x384xbf16, #tpu.memory_space<vmem>>, vector<32x384xbf16>
    %cst_11 = arith.constant dense<0.000000e+00> : vector<8x384xf32>
    %26 = tpu.matmul %24, %25, %cst_11 {dimension_numbers = #tpu.dot_dimension_numbers<[1], [0], [0], [1], [0, 0, 1, 1], [], []>} : vector<8x32xbf16>, vector<32x384xbf16>, vector<8x384xf32> -> vector<8x384xf32>
    %c0_12 = arith.constant 0 : index
    %c0_13 = arith.constant 0 : index
    %27 = vector.load %arg5[%c0_12, %c0_13] : memref<1x384xbf16, #tpu.memory_space<vmem>>, vector<1x384xbf16>
    %28 = arith.extf %27 : vector<1x384xbf16> to vector<1x384xf32>
    %29 = vector.broadcast %28 : vector<1x384xf32> to vector<8x384xf32>
    %30 = arith.addf %26, %29 : vector<8x384xf32>
    %31 = arith.truncf %30 : vector<8x384xf32> to vector<8x384xbf16>
    %c0_14 = arith.constant 0 : index
    %c0_15 = arith.constant 0 : index
    %32 = vector.load %arg8[%c0_14, %c0_15] : memref<8x384xbf16, #tpu.memory_space<vmem>>, vector<8x384xbf16>
    tpu.vector_store %arg8[%c0_14, %c0_15], %31 {strides = array<i32>} : memref<8x384xbf16, #tpu.memory_space<vmem>>, vector<8x384xbf16>,
    return
  }
  func.func @transform_0(%arg0: i32, %arg1: i32, %arg2: i32) -> (i32, i32) {
    %c0_i32 = arith.constant 0 : i32
    return %arg0, %arg2 : i32, i32
  }
  func.func @transform_1(%arg0: i32, %arg1: i32, %arg2: i32) -> (i32, i32) {
    %c0_i32 = arith.constant 0 : i32
    return %arg2, %arg1 : i32, i32
  }
  func.func @transform_2(%arg0: i32, %arg1: i32, %arg2: i32) -> (i32, i32) {
    %c0_i32 = arith.constant 0 : i32
    %c0_i32_0 = arith.constant 0 : i32
    return %c0_i32, %arg1 : i32, i32
  }
  func.func @transform_3(%arg0: i32, %arg1: i32, %arg2: i32) -> (i32, i32) {
    %c0_i32 = arith.constant 0 : i32
    %c0_i32_0 = arith.constant 0 : i32
    %c0_i32_1 = arith.constant 0 : i32
    return %c0_i32, %c0_i32_0 : i32, i32
  }
  func.func @transform_4(%arg0: i32, %arg1: i32, %arg2: i32) -> (i32, i32) {
    %c0_i32 = arith.constant 0 : i32
    %c0_i32_0 = arith.constant 0 : i32
    %c0_i32_1 = arith.constant 0 : i32
    return %c0_i32, %c0_i32_0 : i32, i32
  }
  func.func @transform_5(%arg0: i32, %arg1: i32, %arg2: i32) -> (i32, i32) {
    %c0_i32 = arith.constant 0 : i32
    return %arg0, %arg1 : i32, i32
  }
}

module attributes {stable_mosaic.version = 11 : i64} {
  func.func @kernel(%arg0: i32, %arg1: i32, %arg2: i32, %arg3: memref<8x32xbf16, #tpu.memory_space<vmem>>, %arg4: memref<32x128xbf16, #tpu.memory_space<vmem>>, %arg5: memref<1x128xbf16, #tpu.memory_space<vmem>>, %arg6: memref<8x128xbf16, #tpu.memory_space<vmem>>, %arg7: memref<8x128xbf16, #tpu.memory_space<vmem>>) attributes {dimension_semantics = [#tpu.dimension_semantics<parallel>, #tpu.dimension_semantics<parallel>, #tpu.dimension_semantics<arbitrary>], iteration_bounds = array<i64: 2, 1, 1>, scalar_prefetch = 0 : i64, scratch_operands = 0 : i64, tpu.core_type = #tpu.core_type<tc>, window_params = [{transform_indices = @transform_0, window_bounds = array<i64: 8, 32>}, {transform_indices = @transform_1, window_bounds = array<i64: 32, 128>}, {transform_indices = @transform_2, window_bounds = array<i64: 1, 128>}, {transform_indices = @transform_3, window_bounds = array<i64: 8, 128>}, {transform_indices = @transform_4, window_bounds = array<i64: 8, 128>}]} {
    %c0 = arith.constant 0 : index
    %c0_0 = arith.constant 0 : index
    %0 = vector.load %arg3[%c0, %c0_0] : memref<8x32xbf16, #tpu.memory_space<vmem>>, vector<8x32xbf16>
    %c0_1 = arith.constant 0 : index
    %c0_2 = arith.constant 0 : index
    %1 = vector.load %arg4[%c0_1, %c0_2] : memref<32x128xbf16, #tpu.memory_space<vmem>>, vector<32x128xbf16>
    %cst = arith.constant dense<0.000000e+00> : vector<8x128xf32>
    %2 = tpu.matmul %0, %1, %cst {dimension_numbers = #tpu.dot_dimension_numbers<[1], [0], [0], [1], [0, 0, 1, 1], [], []>} : vector<8x32xbf16>, vector<32x128xbf16>, vector<8x128xf32> -> vector<8x128xf32>
    %c0_3 = arith.constant 0 : index
    %c0_4 = arith.constant 0 : index
    %3 = vector.load %arg5[%c0_3, %c0_4] : memref<1x128xbf16, #tpu.memory_space<vmem>>, vector<1x128xbf16>
    %4 = arith.extf %3 : vector<1x128xbf16> to vector<1x128xf32>
    %5 = vector.broadcast %4 : vector<1x128xf32> to vector<8x128xf32>
    %6 = arith.addf %2, %5 : vector<8x128xf32>
    %c0_5 = arith.constant 0 : index
    %c0_6 = arith.constant 0 : index
    %7 = vector.load %arg6[%c0_5, %c0_6] : memref<8x128xbf16, #tpu.memory_space<vmem>>, vector<8x128xbf16>
    %8 = arith.extf %7 : vector<8x128xbf16> to vector<8x128xf32>
    %9 = arith.addf %6, %8 : vector<8x128xf32>
    %10 = arith.truncf %9 : vector<8x128xf32> to vector<8x128xbf16>
    %c0_7 = arith.constant 0 : index
    %c0_8 = arith.constant 0 : index
    %11 = vector.load %arg7[%c0_7, %c0_8] : memref<8x128xbf16, #tpu.memory_space<vmem>>, vector<8x128xbf16>
    tpu.vector_store %arg7[%c0_7, %c0_8], %10 {strides = array<i32>} : memref<8x128xbf16, #tpu.memory_space<vmem>>, vector<8x128xbf16>,
    return
  }
  func.func @transform_0(%arg0: i32, %arg1: i32, %arg2: i32) -> (i32, i32) {
    %c0_i32 = arith.constant 0 : i32
    return %arg0, %arg2 : i32, i32
  }
  func.func @transform_1(%arg0: i32, %arg1: i32, %arg2: i32) -> (i32, i32) {
    %c0_i32 = arith.constant 0 : i32
    return %arg2, %arg1 : i32, i32
  }
  func.func @transform_2(%arg0: i32, %arg1: i32, %arg2: i32) -> (i32, i32) {
    %c0_i32 = arith.constant 0 : i32
    %c0_i32_0 = arith.constant 0 : i32
    return %c0_i32, %arg1 : i32, i32
  }
  func.func @transform_3(%arg0: i32, %arg1: i32, %arg2: i32) -> (i32, i32) {
    %c0_i32 = arith.constant 0 : i32
    return %arg0, %arg1 : i32, i32
  }
  func.func @transform_4(%arg0: i32, %arg1: i32, %arg2: i32) -> (i32, i32) {
    %c0_i32 = arith.constant 0 : i32
    return %arg0, %arg1 : i32, i32
  }
}

module attributes {stable_mosaic.version = 11 : i64} {
  func.func @kernel(%arg0: i32, %arg1: i32, %arg2: i32, %arg3: memref<8x32xbf16, #tpu.memory_space<vmem>>, %arg4: memref<32x128xbf16, #tpu.memory_space<vmem>>, %arg5: memref<1x128xbf16, #tpu.memory_space<vmem>>, %arg6: memref<1x32xf32, #tpu.memory_space<vmem>>, %arg7: memref<1x32xf32, #tpu.memory_space<vmem>>, %arg8: memref<8x128xbf16, #tpu.memory_space<vmem>>) attributes {dimension_semantics = [#tpu.dimension_semantics<parallel>, #tpu.dimension_semantics<parallel>, #tpu.dimension_semantics<arbitrary>], iteration_bounds = array<i64: 2, 1, 1>, scalar_prefetch = 0 : i64, scratch_operands = 0 : i64, tpu.core_type = #tpu.core_type<tc>, window_params = [{transform_indices = @transform_0, window_bounds = array<i64: 8, 32>}, {transform_indices = @transform_1, window_bounds = array<i64: 32, 128>}, {transform_indices = @transform_2, window_bounds = array<i64: 1, 128>}, {pipeline_mode = #tpu.pipeline_mode<synchronous>, transform_indices = @transform_3, window_bounds = array<i64: 1, 32>}, {pipeline_mode = #tpu.pipeline_mode<synchronous>, transform_indices = @transform_4, window_bounds = array<i64: 1, 32>}, {transform_indices = @transform_5, window_bounds = array<i64: 8, 128>}]} {
    %c0 = arith.constant 0 : index
    %c0_0 = arith.constant 0 : index
    %0 = vector.load %arg3[%c0, %c0_0] : memref<8x32xbf16, #tpu.memory_space<vmem>>, vector<8x32xbf16>
    %1 = arith.extf %0 : vector<8x32xbf16> to vector<8x32xf32>
    %cst = arith.constant dense<0.000000e+00> : vector<8xf32>
    %2 = vector.multi_reduction <add>, %1, %cst [1] : vector<8x32xf32> to vector<8xf32>
    %3 = vector.shape_cast %2 : vector<8xf32> to vector<8x1xf32>
    %cst_1 = arith.constant 3.200000e+01 : f32
    %4 = vector.broadcast %cst_1 : f32 to vector<8x1xf32>
    %5 = arith.divf %3, %4 : vector<8x1xf32>
    %6 = vector.broadcast %5 : vector<8x1xf32> to vector<8x32xf32>
    %7 = arith.subf %1, %6 : vector<8x32xf32>
    %8 = arith.mulf %7, %7 : vector<8x32xf32>
    %cst_2 = arith.constant dense<0.000000e+00> : vector<8xf32>
    %9 = vector.multi_reduction <add>, %8, %cst_2 [1] : vector<8x32xf32> to vector<8xf32>
    %10 = vector.shape_cast %9 : vector<8xf32> to vector<8x1xf32>
    %cst_3 = arith.constant 3.200000e+01 : f32
    %11 = vector.broadcast %cst_3 : f32 to vector<8x1xf32>
    %12 = arith.divf %10, %11 : vector<8x1xf32>
    %cst_4 = arith.constant 9.99999996E-13 : f32
    %13 = vector.broadcast %cst_4 : f32 to vector<8x1xf32>
    %14 = arith.addf %12, %13 : vector<8x1xf32>
    %15 = math.rsqrt %14 : vector<8x1xf32>
    %16 = vector.broadcast %15 : vector<8x1xf32> to vector<8x32xf32>
    %17 = arith.mulf %7, %16 : vector<8x32xf32>
    %c0_5 = arith.constant 0 : index
    %c0_6 = arith.constant 0 : index
    %18 = vector.load %arg6[%c0_5, %c0_6] : memref<1x32xf32, #tpu.memory_space<vmem>>, vector<1x32xf32>
    %19 = vector.broadcast %18 : vector<1x32xf32> to vector<8x32xf32>
    %20 = arith.mulf %17, %19 : vector<8x32xf32>
    %c0_7 = arith.constant 0 : index
    %c0_8 = arith.constant 0 : index
    %21 = vector.load %arg7[%c0_7, %c0_8] : memref<1x32xf32, #tpu.memory_space<vmem>>, vector<1x32xf32>
    %22 = vector.broadcast %21 : vector<1x32xf32> to vector<8x32xf32>
    %23 = arith.addf %20, %22 : vector<8x32xf32>
    %24 = arith.truncf %23 : vector<8x32xf32> to vector<8x32xbf16>
    %c0_9 = arith.constant 0 : index
    %c0_10 = arith.constant 0 : index
    %25 = vector.load %arg4[%c0_9, %c0_10] : memref<32x128xbf16, #tpu.memory_space<vmem>>, vector<32x128xbf16>
    %cst_11 = arith.constant dense<0.000000e+00> : vector<8x128xf32>
    %26 = tpu.matmul %24, %25, %cst_11 {dimension_numbers = #tpu.dot_dimension_numbers<[1], [0], [0], [1], [0, 0, 1, 1], [], []>} : vector<8x32xbf16>, vector<32x128xbf16>, vector<8x128xf32> -> vector<8x128xf32>
    %c0_12 = arith.constant 0 : index
    %c0_13 = arith.constant 0 : index
    %27 = vector.load %arg5[%c0_12, %c0_13] : memref<1x128xbf16, #tpu.memory_space<vmem>>, vector<1x128xbf16>
    %28 = arith.extf %27 : vector<1x128xbf16> to vector<1x128xf32>
    %29 = vector.broadcast %28 : vector<1x128xf32> to vector<8x128xf32>
    %30 = arith.addf %26, %29 : vector<8x128xf32>
    %31 = arith.mulf %30, %30 : vector<8x128xf32>
    %32 = arith.mulf %30, %31 : vector<8x128xf32>
    %cst_14 = arith.constant 4.471500e-02 : f32
    %33 = vector.broadcast %cst_14 : f32 to vector<8x128xf32>
    %34 = arith.mulf %33, %32 : vector<8x128xf32>
    %35 = arith.addf %30, %34 : vector<8x128xf32>
    %cst_15 = arith.constant 0.797884583 : f32
    %36 = vector.broadcast %cst_15 : f32 to vector<8x128xf32>
    %37 = arith.mulf %36, %35 : vector<8x128xf32>
    %38 = math.tanh %37 : vector<8x128xf32>
    %cst_16 = arith.constant 1.000000e+00 : f32
    %39 = vector.broadcast %cst_16 : f32 to vector<8x128xf32>
    %40 = arith.addf %39, %38 : vector<8x128xf32>
    %cst_17 = arith.constant 5.000000e-01 : f32
    %41 = vector.broadcast %cst_17 : f32 to vector<8x128xf32>
    %42 = arith.mulf %41, %40 : vector<8x128xf32>
    %43 = arith.mulf %30, %42 : vector<8x128xf32>
    %44 = arith.truncf %43 : vector<8x128xf32> to vector<8x128xbf16>
    %c0_18 = arith.constant 0 : index
    %c0_19 = arith.constant 0 : index
    %45 = vector.load %arg8[%c0_18, %c0_19] : memref<8x128xbf16, #tpu.memory_space<vmem>>, vector<8x128xbf16>
    tpu.vector_store %arg8[%c0_18, %c0_19], %44 {strides = array<i32>} : memref<8x128xbf16, #tpu.memory_space<vmem>>, vector<8x128xbf16>,
    return
  }
  func.func @transform_0(%arg0: i32, %arg1: i32, %arg2: i32) -> (i32, i32) {
    %c0_i32 = arith.constant 0 : i32
    return %arg0, %arg2 : i32, i32
  }
  func.func @transform_1(%arg0: i32, %arg1: i32, %arg2: i32) -> (i32, i32) {
    %c0_i32 = arith.constant 0 : i32
    return %arg2, %arg1 : i32, i32
  }
  func.func @transform_2(%arg0: i32, %arg1: i32, %arg2: i32) -> (i32, i32) {
    %c0_i32 = arith.constant 0 : i32
    %c0_i32_0 = arith.constant 0 : i32
    return %c0_i32, %arg1 : i32, i32
  }
  func.func @transform_3(%arg0: i32, %arg1: i32, %arg2: i32) -> (i32, i32) {
    %c0_i32 = arith.constant 0 : i32
    %c0_i32_0 = arith.constant 0 : i32
    %c0_i32_1 = arith.constant 0 : i32
    return %c0_i32, %c0_i32_0 : i32, i32
  }
  func.func @transform_4(%arg0: i32, %arg1: i32, %arg2: i32) -> (i32, i32) {
    %c0_i32 = arith.constant 0 : i32
    %c0_i32_0 = arith.constant 0 : i32
    %c0_i32_1 = arith.constant 0 : i32
    return %c0_i32, %c0_i32_0 : i32, i32
  }
  func.func @transform_5(%arg0: i32, %arg1: i32, %arg2: i32) -> (i32, i32) {
    %c0_i32 = arith.constant 0 : i32
    return %arg0, %arg1 : i32, i32
  }
}

module attributes {stable_mosaic.version = 11 : i64} {
  func.func @kernel(%arg0: i32, %arg1: i32, %arg2: i32, %arg3: memref<8x128xbf16, #tpu.memory_space<vmem>>, %arg4: memref<128x128xbf16, #tpu.memory_space<vmem>>, %arg5: memref<1x128xbf16, #tpu.memory_space<vmem>>, %arg6: memref<8x128xbf16, #tpu.memory_space<vmem>>, %arg7: memref<8x128xbf16, #tpu.memory_space<vmem>>) attributes {dimension_semantics = [#tpu.dimension_semantics<parallel>, #tpu.dimension_semantics<parallel>, #tpu.dimension_semantics<arbitrary>], iteration_bounds = array<i64: 2, 1, 1>, scalar_prefetch = 0 : i64, scratch_operands = 0 : i64, tpu.core_type = #tpu.core_type<tc>, window_params = [{transform_indices = @transform_0, window_bounds = array<i64: 8, 128>}, {transform_indices = @transform_1, window_bounds = array<i64: 128, 128>}, {transform_indices = @transform_2, window_bounds = array<i64: 1, 128>}, {transform_indices = @transform_3, window_bounds = array<i64: 8, 128>}, {transform_indices = @transform_4, window_bounds = array<i64: 8, 128>}]} {
    %c0 = arith.constant 0 : index
    %c0_0 = arith.constant 0 : index
    %0 = vector.load %arg3[%c0, %c0_0] : memref<8x128xbf16, #tpu.memory_space<vmem>>, vector<8x128xbf16>
    %c0_1 = arith.constant 0 : index
    %c0_2 = arith.constant 0 : index
    %1 = vector.load %arg4[%c0_1, %c0_2] : memref<128x128xbf16, #tpu.memory_space<vmem>>, vector<128x128xbf16>
    %cst = arith.constant dense<0.000000e+00> : vector<8x128xf32>
    %2 = tpu.matmul %0, %1, %cst {dimension_numbers = #tpu.dot_dimension_numbers<[1], [0], [0], [1], [0, 0, 1, 1], [], []>} : vector<8x128xbf16>, vector<128x128xbf16>, vector<8x128xf32> -> vector<8x128xf32>
    %c0_3 = arith.constant 0 : index
    %c0_4 = arith.constant 0 : index
    %3 = vector.load %arg5[%c0_3, %c0_4] : memref<1x128xbf16, #tpu.memory_space<vmem>>, vector<1x128xbf16>
    %4 = arith.extf %3 : vector<1x128xbf16> to vector<1x128xf32>
    %5 = vector.broadcast %4 : vector<1x128xf32> to vector<8x128xf32>
    %6 = arith.addf %2, %5 : vector<8x128xf32>
    %c0_5 = arith.constant 0 : index
    %c0_6 = arith.constant 0 : index
    %7 = vector.load %arg6[%c0_5, %c0_6] : memref<8x128xbf16, #tpu.memory_space<vmem>>, vector<8x128xbf16>
    %8 = arith.extf %7 : vector<8x128xbf16> to vector<8x128xf32>
    %9 = arith.addf %6, %8 : vector<8x128xf32>
    %10 = arith.truncf %9 : vector<8x128xf32> to vector<8x128xbf16>
    %c0_7 = arith.constant 0 : index
    %c0_8 = arith.constant 0 : index
    %11 = vector.load %arg7[%c0_7, %c0_8] : memref<8x128xbf16, #tpu.memory_space<vmem>>, vector<8x128xbf16>
    tpu.vector_store %arg7[%c0_7, %c0_8], %10 {strides = array<i32>} : memref<8x128xbf16, #tpu.memory_space<vmem>>, vector<8x128xbf16>,
    return
  }
  func.func @transform_0(%arg0: i32, %arg1: i32, %arg2: i32) -> (i32, i32) {
    %c0_i32 = arith.constant 0 : i32
    return %arg0, %arg2 : i32, i32
  }
  func.func @transform_1(%arg0: i32, %arg1: i32, %arg2: i32) -> (i32, i32) {
    %c0_i32 = arith.constant 0 : i32
    return %arg2, %arg1 : i32, i32
  }
  func.func @transform_2(%arg0: i32, %arg1: i32, %arg2: i32) -> (i32, i32) {
    %c0_i32 = arith.constant 0 : i32
    %c0_i32_0 = arith.constant 0 : i32
    return %c0_i32, %arg1 : i32, i32
  }
  func.func @transform_3(%arg0: i32, %arg1: i32, %arg2: i32) -> (i32, i32) {
    %c0_i32 = arith.constant 0 : i32
    return %arg0, %arg1 : i32, i32
  }
  func.func @transform_4(%arg0: i32, %arg1: i32, %arg2: i32) -> (i32, i32) {
    %c0_i32 = arith.constant 0 : i32
    return %arg0, %arg1 : i32, i32
  }
}

</mosaic_0001>

<bundles_post_ra>
// kernel: tpu_custom_call.1
= control target key start
LH: loop header
LB: loop body
LE: loop exit
PB: predicated region body
PF: predicated region fallthrough
CT: control target
= control target key end

     0   :  { %6 = vsyncpa [#allocation3], 0  ;;  %s448_s0 = inlined_call_operand.hbm [shape: f32[8,128], index: 0, kind: input, shape index: {}]   ;;  %s449_s1 = inlined_call_operand.hbm [shape: f32[16,128], index: 1, kind: output, shape index: {}]  }
   0x1   :  { %7 = vsyncpa [#allocation4], 0 }
   0x2   :  { %9 = vsyncpa [#allocation4 + $0x1], 0  ;;  %s348_s6 = smov 0   ;;  %s350_s7 = smov 0  }
   0x3   :  { %s352_s8 = smov 0   ;;  %s354_s9 = smov 0  }
   0x4 LB: > { %s369_s10 = sadd.s32 4294967295, %s334_s9   ;;  %s184_s11 = sadd.s32 4294967294, %s334_s9   ;;  %s334_s9 = sphi %s354_s9, %s457_s9   ;;  %s330_s8 = sphi %s352_s8, %s456_s8   ;;  %s326_s7 = sphi %s350_s7, %s455_s7   ;;  %s322_s6 = sphi %s348_s6, %s454_s6  }
   0x5   : > { %s373_s12 = sadd.s32 1, %s334_s9   ;;  %s43_s13 = sadd.s32 1, %s330_s8 }
   0x6   : > { %s40_s14 = ssub.s32 %s334_s9, %s373_s12  ;;  %p53_p0 = scmp.ne.s32.totalorder %s330_s8, %s326_s7 }
   0x7   : > { %p41_p1 = scmp.eq.s32.totalorder %s40_s14, 0  ;;  %p54_p2 = scmp.eq.s32.totalorder %s369_s10, 1 }
   0x8   : > { %p59_p3 = scmp.ne.s32.totalorder %s326_s7, %s322_s6  ;;  %p60_p4 = scmp.eq.s32.totalorder %s184_s11, 1 }
   0x9   : > { %s384_s15 = scalar_select %p41_p1, %s330_s8, %s43_s13  }
   0xa   : > { %p386_p5 = por %p54_p2, %p53_p0  ;;  %p390_p6 = por %p60_p4, %p59_p3 }
   0xb   : > { %p185_p7 = scmp.ge.s32.totalorder %s334_s9, 1  ;;  %p67_p8 = scmp.lt.s32.totalorder %s334_s9, 3 }
   0xc   : > { %s451_s17 = scalar_select %p390_p6, 1, 0 }
   0xd   : > { %p208_p9 = scmp.eq.s32.totalorder %s369_s10, 0  ;;  %p397_p10 = pnand %p185_p7, %p67_p8 }
   0xe   : > { %s336_s19 = smov [#allocation2]  }
   0xf   : > { %s80_s20 = sshll.u32 %s336_s19, 4  ;;  %p200_p11 = pneg %p397_p10  ;;  %s81_s20 = int_to_ptr.vmem [resolvable:$true] %s80_s20 }
  0x10   : > { %s255_s21 = scalar_lea.vmem %s81_s20, 128  ;;  %p263_p3 = scmp.lt.s32.totalorder %s81_s20, %s81_s20 }
  0x11   : > { %p201_p12 = pnand %p208_p9, %p200_p11  ;;  %p256_p0 = scmp.ne.s32.totalorder %s81_s20, %s255_s21 }
  0x12   : > { %p264_p4 = scmp.lt.s32.totalorder %s255_s21, %s255_s21 }
  0x13   : > { %p246_p13 = pneg %p201_p12 }
  0x14   : > { %p265_p6 = por %p264_p4, %p263_p3 }
  0x15   : > { %p258_p1 = pnand %p256_p0, %p246_p13 }
  0x17   : > { %p259_p2 = pneg %p258_p1 }
  0x19   : > { %p266_p7 = pnand %p265_p6, %p259_p2 }
  0x1b   : > { %269 = shalt.err (!%p266_p7)
}
  0x1c   : > { %203 = dma.hbm_to_vmem [thread:$0]  (!%p201_p12), %s448_s0, 128, %s81_s20, [#allocation3]  }
  0x1d   : > { %93 = sbr.rel (%p397_p10) target bundleno = 60 (0x3c), region = 24 }
  0x22   : > { %313 = dma.done.wait (%p208_p9), [#allocation3], 128  }
  0x23   : > { %315 = vsyncadd (%p208_p9), [#allocation3], 4294967168  ;;  %s105_s24 = sand.u32 1, %s326_s7   ;;  %s191_s28 = sshll.u32 %s369_s10, 7  ;;  %v108_v0 = vld [vmem:[#allocation2] sm:$0xff] }
  0x24   : > { %s189_s25 = sshll.u32 %s105_s24, 3  ;;  %v109_v1 = vadd.f32 1.0, %v108_v0  ;;  %s123_s2 = scalar_lea.hbm %s449_s1, %s191_s28 }
  0x25   : > { %s107_s26 = scalar_lea.vmem [#allocation5], %s189_s25  ;;  %s112_s3 = scalar_lea.sflag [#allocation4], %s105_s24 }
  0x26   : > { %s125_s27 = sshll.u32 %s107_s26, 4  ;;  %110 = vst [vmem:[%s107_s26] sm:$0xff] %v109_v1  ;;  %s337_s5 = smov [#allocation5]   ;;  %s126_s27 = int_to_ptr.vmem [resolvable:$true] %s125_s27 }
  0x27   : > { %s270_s4 = scalar_lea.vmem %s126_s27, 128  ;;  %s274_s11 = sshll.u32 %s337_s5, 4  ;;  %s275_s11 = int_to_ptr.vmem [resolvable:$false] %s274_s11 }
  0x28   : > { %p271_p6 = scmp.ne.s32.totalorder %s126_s27, %s270_s4  ;;  %s276_s13 = scalar_lea.vmem %s275_s11, 256 }
  0x29   : > { %p277_p10 = scmp.lt.s32.totalorder %s126_s27, %s275_s11  ;;  %p278_p11 = scmp.lt.s32.totalorder %s276_s13, %s270_s4 }
  0x2a   : > { %p272_p8 = pnand %p271_p6, %p386_p5 }
  0x2b   : > { %p279_p12 = por %p278_p11, %p277_p10 }
  0x2c   : > { %p273_p9 = pneg %p272_p8 }
  0x2e   : > { %p280_p13 = pnand %p279_p12, %p273_p9 }
  0x30   : > { %283 = shalt.err (!%p280_p13)
}
  0x31   : > { %s284_s10 = scalar_lea.hbm %s123_s2, 128  ;;  %s288_s19 = scalar_lea.hbm %s449_s1, 256 }
  0x32   : > { %p285_p0 = scmp.ne.s32.totalorder %s123_s2, %s284_s10  ;;  %p289_p3 = scmp.lt.s32.totalorder %s123_s2, %s449_s1 }
  0x33   : > { %p290_p4 = scmp.lt.s32.totalorder %s288_s19, %s284_s10 }
  0x34   : > { %p286_p1 = pnand %p285_p0, %p386_p5 }
  0x35   : > { %p291_p7 = por %p290_p4, %p289_p3 }
  0x36   : > { %p287_p2 = pneg %p286_p1 }
  0x38   : > { %p292_p6 = pnand %p291_p7, %p287_p2 }
  0x3a   : > { %295 = shalt.err (!%p292_p6)
}
  0x3b   : > { %198 = dma.vmem_to_hbm [thread:$0]  (%p386_p5), %s126_s27, 128, %s123_s2, %s112_s3  }
  0x3c PF: > { %p210_p8 = scmp.ge.s32.totalorder %s334_s9, 2  ;;  %s137_s22 = sand.u32 1, %s322_s6  }
  0x3d   : > { %p453_p9 = scmp.ne.s32.totalorder %s451_s17, 0  ;;  %s138_s23 = scalar_lea.sflag [#allocation4], %s137_s22 }
  0x3f   : > { %p205_p10 = pnand %p210_p8, %p453_p9 }
  0x41   : > { %p206_p11 = pneg %p205_p10 }
  0x43   : > { %317 = dma.done.wait (%p206_p11), %s138_s23, 128  }
  0x44   : > { %319 = vsyncadd (%p206_p11), %s138_s23, 4294967168  ;;  %p12_p12 = scmp.ge.s32.totalorder %s373_s12, 4   ;;  %s454_s6 = smov %s326_s7 }
  0x45   : > { %s455_s7 = smov %s330_s8  ;;  %s456_s8 = smov %s384_s15 }
  0x46   : > { %s457_s9 = smov %s373_s12  ;;  %14 = sbr.rel (!%p12_p12) target bundleno = 4 (0x4), region = 61 }
  0x4b   :  { %143 = vsyncpa [#allocation3], 1 }
  0x4c   :  { %145 = vsyncpa [#allocation3 + $0x1], 1 }
  0x4d   :  { %146 = vsyncpa [#allocation4], 1 }
  0x4e   :  { %148 = vsyncpa [#allocation4 + $0x1], 1 }

// kernel: _vit_layer_forward.7
= control target key start
LH: loop header
LB: loop body
LE: loop exit
PB: predicated region body
PF: predicated region fallthrough
CT: control target
= control target key end

     0   :  { %s607_s15 = smov 0   ;;  %s609_s16 = smov 0   ;;  %s652_s0 = inlined_call_operand.vmem [shape: bf16[16,32], index: 0, kind: input, shape index: {}]   ;;  %s653_s1 = inlined_call_operand.vmem [shape: bf16[32,128], index: 1, kind: input, shape index: {}]   ;;  %s654_s2 = inlined_call_operand.vmem [shape: bf16[1,128], index: 2, kind: input, shape index: {}]   ;;  %s655_s3 = inlined_call_operand.vmem [shape: bf16[16,128], index: 3, kind: input, shape index: {}]   ;;  %s656_s4 = inlined_call_operand.vmem [shape: bf16[16,128], index: 4, kind: output, shape index: {}]  }
   0x1   :  { %s611_s17 = smov 0  }
   0x2 LB: > { %s33_s18 = sadd.s32 1, %s574_s16  ;;  %p508_p0 = scmp.ge.s32.totalorder %s578_s17, 1  ;;  %s578_s17 = sphi %s611_s17, %s14_s17   ;;  %s574_s16 = sphi %s609_s16, %s658_s16   ;;  %s570_s15 = sphi %s607_s15, %s657_s15  }
   0x3   : > { %p35_p1 = scmp.ge.s32.totalorder %s33_s18, 2  ;;  %p225_p2 = scmp.lt.s32.totalorder %s578_s17, 3 }
   0x5   : > { %s660_s18 = smov (%p35_p1, %s33_s18), 0  ;;  %p226_p3 = pnand %p508_p0, %p225_p2 }
   0x6   : > { %p273_p4 = scmp.lt.s32.totalorder (!%p226_p3), %s570_s15, 1 }
   0x7   : > { %229 = sbr.rel (%p226_p3) target bundleno = 221 (0xdd), region = 36 }
   0xc   : > { %v554_v0 = vld [vmem:[%s653_s1 + $0x8] sm:$0xff]   ;;  %v580_v1 = vmov 0.0   ;;  %v555_v2 = vld [vmem:[%s653_s1] sm:$0xff]   ;;  %vm581_vm0 = vmmov 0   ;;  %s662_s15 = smov (!%p273_p4, %s570_s15), 1  ;;  %vm330_vm1 = vcmask 261120   ;;  %v314_v4 = vlaneseq }
   0xd   : > { %520 = vmatprep.subr.bf16.mxu0 %v580_v1  ;;  %524 = vmatprep.mubr.msk.bf16.mxu0 %vm581_vm0, %v580_v1  ;;  %s509_s23 = sshll.u32 %s662_s15, 2  ;;  %v312_v6 = vld [vmem:[%s654_s2] sm:$0x1] }
   0xe   : > { %521 = vmatpush3.bf16.msra.mxu0 %v554_v0  ;;  %s279_s26 = scalar_lea.vmem %s652_s0, %s509_s23  ;;  %v315_v5 = vshrl.u32 %v314_v4, 7  ;;  %s298_s5 = scalar_lea.vmem %s655_s3, %s509_s23  ;;  %v313_v7 = vunpack.c.l.bf16 %v312_v6 }
   0xf   : > { %522 = vmatprep.subr.bf16.mxu0 %v580_v1  ;;  %v307_v3 = vld [vmem:[%s279_s26] sm:$0xf]  ;;  %s305_s8 = scalar_lea.vmem %s656_s4, %s509_s23 }
  0x10   : > { %v316_v8 = vsub.s32 0, %v315_v5  ;;  %v374_v9 = vld [vmem:[%s298_s5] sm:$0xf] }
  0x11   : > { %v375_v11 = vunpack.c.l.bf16 %v374_v9 }
  0x12   : > { %523 = vmatpush3.bf16.msra.mxu0 %v555_v2  ;;  %v317_v10 = vrot.slane %v313_v7, %v316_v8 }
  0x15   : > { %525 = vmatmul.mubr.msk.bf16.vlgmr.msra.gmra.mxu0 %vm330_vm1, %v307_v3 }
  0xd5   : > { %v368_v12 = vpop.f32.mrf.mxu0 }
  0xd6   : > { %v369_v13 = vadd.f32 %v368_v12, %v317_v10 }
  0xd7   : > { %v526_v14 = vpop.f32.mrf.mxu0 }
  0xd8   : > { %v376_v15 = vadd.f32 %v375_v11, %v369_v13 }
  0xd9   : > { %v371_v16 = vpop.f32.mrf.mxu0 }
  0xda   : > { %v377_v17 = vpack.c.bf16 %v376_v15, %v376_v15 }
  0xdb   : > { %v527_v18 = vpop.f32.mrf.mxu0 }
  0xdc   : > { %378 = vst [vmem:[%s305_s8] sm:$0xf] %v377_v17 }
  0xdd PF: > { %s14_s17 = sadd.s32 1, %s578_s17   ;;  %s657_s15 = smov %s574_s16 }
  0xde   : > { %p11_p5 = scmp.ge.s32.totalorder %s14_s17, 4   ;;  %s658_s16 = smov %s660_s18 }
  0xe0   :  { %13 = sbr.rel (!%p11_p5) target bundleno = 2 (0x2), region = 75 }

// kernel: _vit_layer_forward.5
= control target key start
LH: loop header
LB: loop body
LE: loop exit
PB: predicated region body
PF: predicated region fallthrough
CT: control target
= control target key end

     0   :  { %s778_s18 = smov 0   ;;  %s780_s19 = smov 0   ;;  %s846_s0 = inlined_call_operand.vmem [shape: bf16[16,32], index: 0, kind: input, shape index: {}]   ;;  %s847_s1 = inlined_call_operand.vmem [shape: bf16[32,384], index: 1, kind: input, shape index: {}]   ;;  %s848_s2 = inlined_call_operand.vmem [shape: bf16[1,384], index: 2, kind: input, shape index: {}]   ;;  %s849_s3 = inlined_call_operand.vmem [shape: f32[1,32], index: 3, kind: input, shape index: {}]   ;;  %s850_s4 = inlined_call_operand.vmem [shape: f32[1,32], index: 4, kind: input, shape index: {}]   ;;  %s851_s5 = inlined_call_operand.vmem [shape: bf16[16,384], index: 5, kind: output, shape index: {}]  }
   0x1   :  { %s782_s20 = smov 0  }
   0x2 LB: > { %s34_s21 = sadd.s32 1, %s739_s19  ;;  %p653_p0 = scmp.ge.s32.totalorder %s743_s20, 1  ;;  %s743_s20 = sphi %s782_s20, %s15_s20   ;;  %s739_s19 = sphi %s780_s19, %s853_s19   ;;  %s735_s18 = sphi %s778_s18, %s852_s18  }
   0x3   : > { %p36_p1 = scmp.ge.s32.totalorder %s34_s21, 2  ;;  %p241_p2 = scmp.lt.s32.totalorder %s743_s20, 3 }
   0x5   : > { %s855_s21 = smov (%p36_p1, %s34_s21), 0  ;;  %p242_p3 = pnand %p653_p0, %p241_p2 }
   0x6   : > { %p289_p4 = scmp.lt.s32.totalorder (!%p242_p3), %s735_s18, 1 }
   0x7   : > { %245 = sbr.rel (%p242_p3) target bundleno = 528 (0x210), region = 40 }
   0xc   : > { %s857_s18 = smov (!%p289_p4, %s735_s18), 1  ;;  %vm326_vm0 = vcmask 261120   ;;  %v711_v8 = vld [vmem:[%s847_s1 + $0x1c] ss:$12 sps:$4 sm:$0xff]   ;;  %v713_v9 = vld [vmem:[%s847_s1 + $0x18] ss:$12 sps:$4 sm:$0xff]   ;;  %v369_v26 = vlaneseq }
   0xd   : > { %s654_s22 = sshll.u32 %s857_s18, 2  ;;  %v745_v10 = vmov 0.0   ;;  %v714_v11 = vld [vmem:[%s847_s1 + $0x20] ss:$12 sps:$4 sm:$0xff]   ;;  %v715_v12 = vld [vmem:[%s847_s1 + $0x4] ss:$12 sps:$4 sm:$0xff]   ;;  %443 = vmatprep.subr.bf16.mxu0 %v711_v8 }
   0xe   : > { %s295_s25 = scalar_lea.vmem %s846_s0, %s654_s22  ;;  %675 = vmatprep.subr.bf16.mxu1 %v745_v10  ;;  %v746_v13 = vmov 0   ;;  %444 = vmatpush1.bf16.msra.mxu0 %v713_v9  ;;  %v717_v14 = vld [vmem:[%s847_s1] ss:$12 sps:$4 sm:$0xff]   ;;  %v718_v15 = vld [vmem:[%s847_s1 + $0x8] ss:$12 sps:$4 sm:$0xff]   ;;  %vm747_vm1 = vmmov 0  }
   0xf   : > { %v324_v0 = vld [vmem:[%s295_s25] sm:$0xf]  ;;  %463 = vmatprep.mubr.bf16.mxu0 %v746_v13  ;;  %676 = vmatpush3.bf16.msra.mxu1 %v714_v11  ;;  %v370_v27 = vshrl.u32 %v369_v26, 7  ;;  %s683_s23 = smul.u32 12, %s857_s18 }
  0x10   : > { %v325_v1 = vunpack.c.l.bf16 %v324_v0  ;;  %445 = vmatprep.subr.bf16.mxu0 %v715_v12  ;;  %677 = vmatprep.subr.bf16.mxu1 %v745_v10  ;;  %v656_v20 = vld [vmem:[%s849_s3] ss:$0 sm:$0xff] }
  0x11   : > { %679 = vmatprep.mubr.msk.bf16.mxu1 %vm747_vm1, %v745_v10  ;;  %v657_v22 = vld [vmem:[%s850_s4] ss:$0 sm:$0xff]  ;;  %v379_v30 = vsub.s32 4, %v370_v27  ;;  %v371_v31 = vsub.s32 0, %v370_v27  ;;  %v375_v32 = vsub.s32 2, %v370_v27  ;;  %s321_s26 = scalar_lea.vmem %s851_s5, %s683_s23 }
  0x12   : > { %v327_v2 = vsel %vm326_vm0, %v325_v1, 0.0  ;;  %446 = vmatpush1.bf16.msra.mxu0 %v717_v14  ;;  %v366_v28 = vld [vmem:[%s848_s2] sm:$0x7] }
  0x13   : > { %328 = vadd.xlane.f32.xlu0 %v327_v2  ;;  %678 = vmatpush3.bf16.msra.mxu1 %v718_v15  ;;  %v367_v29 = vunpack.c.l.bf16 %v366_v28 }
  0x15   : > { %v380_v33 = vrot.slane %v367_v29, %v379_v30  ;;  %v372_v34 = vrot.slane %v367_v29, %v371_v31  ;;  %v376_v35 = vrot.slane %v367_v29, %v375_v32 }
  0x17   : > { %v395_v36 = vrot.slane %v380_v33, %v371_v31  ;;  %v387_v37 = vrot.slane %v372_v34, %v371_v31  ;;  %v391_v38 = vrot.slane %v376_v35, %v371_v31 }
  0x9c   : > { %v329_v3 = vpop.xlane.xlu0 %328 }
  0x9d   : > { %v331_v4 = vmul.f32 0.03125, %v329_v3 }
  0x9f   : > { %v332_v5 = vsub.f32 %v325_v1, %v331_v4 }
  0xa1   : > { %v333_v6 = vmul.f32 %v332_v5, %v332_v5 }
  0xa3   : > { %v334_v7 = vsel %vm326_vm0, %v333_v6, 0.0 }
  0xa4   : > { %335 = vadd.xlane.f32.xlu0 %v334_v7 }
 0x12d   : > { %v336_v16 = vpop.xlane.xlu0 %335 }
 0x12e   : > { %v337_v17 = vmul.f32 0.03125, %v336_v16 }
 0x130   : > { %v338_v18 = vadd.f32 1e-12, %v337_v17 }
 0x132   : > { %719 = vrsqrt.f32 %v338_v18 }
 0x13f   : > { %v720_v19 = vpop.eup %719 }
 0x140   : > { %v340_v21 = vmul.f32 %v720_v19, %v332_v5 }
 0x142   : > { %v348_v23 = vmul.f32 %v656_v20, %v340_v21 }
 0x144   : > { %v356_v24 = vadd.f32 %v657_v22, %v348_v23 }
 0x146   : > { %v357_v25 = vpack.c.bf16 %v356_v24, %v356_v24 }
 0x148   : > { %664 = vmatmul.mubr.msk.bf16.vlgmr.msra.gmra.mxu0 %vm326_vm0, %v357_v25  ;;  %680 = vmatmul.mubr.msk.bf16.vlgmr.msra.gmra.mxu1 %vm326_vm0, %v357_v25 }
 0x208   : > { %v465_v39 = vpop.f32.mrf.mxu0  ;;  %v506_v40 = vpop.f32.mrf.mxu1 }
 0x209   : > { %v507_v41 = vadd.f32 %v506_v40, %v395_v36  ;;  %v466_v44 = vadd.f32 %v465_v39, %v387_v37 }
 0x20a   : > { %v467_v42 = vpop.f32.mrf.mxu0  ;;  %v681_v43 = vpop.f32.mrf.mxu1 }
 0x20b   : > { %v671_v45 = vpack.c.bf16 %v507_v41, %v507_v41  ;;  %v468_v46 = vadd.f32 %v467_v42, %v391_v38 }
 0x20c   : > { %v469_v47 = vpop.f32.mrf.mxu0  ;;  %v509_v48 = vpop.f32.mrf.mxu1 }
 0x20d   : > { %526 = vst [vmem:[%s321_s26 + $0x8] sm:$0xf] %v671_v45  ;;  %v670_v49 = vpack.c.bf16 %v468_v46, %v466_v44 }
 0x20e   : > { %v470_v50 = vpop.f32.mrf.mxu0  ;;  %v682_v51 = vpop.f32.mrf.mxu1 }
 0x20f   : > { %525 = vst [vmem:[%s321_s26] sm:$0xff] %v670_v49 }
 0x210 PF: > { %s15_s20 = sadd.s32 1, %s743_s20   ;;  %s852_s18 = smov %s739_s19 }
 0x211   : > { %p12_p5 = scmp.ge.s32.totalorder %s15_s20, 4   ;;  %s853_s19 = smov %s855_s21 }
 0x213   :  { %14 = sbr.rel (!%p12_p5) target bundleno = 2 (0x2), region = 76 }

// kernel: _vit_layer_forward.6
= control target key start
LH: loop header
LB: loop body
LE: loop exit
PB: predicated region body
PF: predicated region fallthrough
CT: control target
= control target key end

     0   :  { %s661_s12 = smov 0   ;;  %s720_s0 = inlined_call_operand.vmem [shape: bf16[2,8,384], index: 0, kind: input, shape index: {}, may-alias: {0,1,2}]   ;;  %s721_s1 = inlined_call_operand.vmem [shape: bf16[2,8,384], index: 1, kind: input, shape index: {}, may-alias: {0,1,2}]   ;;  %s722_s2 = inlined_call_operand.vmem [shape: bf16[2,8,384], index: 2, kind: input, shape index: {}, may-alias: {0,1,2}]   ;;  %s723_s3 = inlined_call_operand.vmem [shape: bf16[2,8,32], index: 3, kind: output, shape index: {}]  }
   0x1 LB: > { %s549_s13 = sadd.s32 4294967295, %s635_s12   ;;  %p553_p0 = scmp.ge.s32.totalorder %s635_s12, 1  ;;  %s635_s12 = sphi %s661_s12, %s13_s12  }
   0x2   : > { %p159_p1 = scmp.lt.s32.totalorder %s635_s12, 3 }
   0x4   : > { %p160_p2 = pnand %p553_p0, %p159_p1 }
   0x5   : > { %p194_p3 = scmp.lt.s32.totalorder (!%p160_p2), %s549_s13, 1  ;;  %s639_s21 = smov (!%p160_p2), 112  }
   0x6   : > { %163 = sbr.rel (%p160_p2) target bundleno = 1357 (0x54d), region = 32  ;;  %s640_s29 = smov (!%p160_p2), 16  }
   0xb   : > { %v637_v0 = vmov 0.0   ;;  %vm638_vm0 = vmmov 0   ;;  %s725_s13 = smov (!%p194_p3, %s549_s13), 1  ;;  %vm219_vm1 = vcmask 130048   ;;  %vm266_vm2 = vcmask 64512  }
   0xc   : > { %581 = vmatprep.subr.bf16.mxu0 %v637_v0  ;;  %583 = vmatprep.mubr.msk.bf16.mxu0 %vm638_vm0, %v637_v0  ;;  %s674_s14 = smul.u32 12, %s725_s13  ;;  %vm282_vm3 = vcmask 1043456   ;;  %s557_s25 = sshll.u32 %s725_s13, 2  ;;  %vm327_vm4 = vcmask 125952   ;;  %vm458_vm5 = vcmask 257152  }
   0xd   : > { %587 = vmatprep.subr.bf16.mxu1 %v637_v0  ;;  %589 = vmatprep.mubr.msk.bf16.mxu1 %vm638_vm0, %v637_v0  ;;  %s707_s28 = scalar_lea.vmem %s723_s3, %s557_s25 }
   0xe   : > { %s505_s17 = scalar_lea.vmem %s721_s1, %s674_s14  ;;  %s198_s20 = scalar_lea.vmem %s720_s0, %s674_s14 }
   0xf   : > { %v558_v1 = vld [vmem:[%s505_s17 + $0x4] sm:$0xf]  ;;  %v216_v3 = vld [vmem:[%s198_s20] sm:$0xf]  ;;  %s695_s24 = scalar_lea.vmem %s722_s2, %s674_s14 }
  0x10   : > { %v224_v2 = vsel %vm219_vm1, %v558_v1, 0  ;;  %v618_v9 = vld [vmem:[%s505_s17 + $0x4] ss:$0 sps:$4 sm:$0xff]   ;;  %v619_v10 = vld [vmem:[%s198_s20] ss:$0 sps:$4 sm:$0xff]  }
  0x11   : > { %582 = vmatpush3.bf16.xpose.msra.mxu0 %v224_v2  ;;  %340 = vrot.lane.b32.xlu1 %v618_v9, %s639_s21  ;;  %v559_v16 = vld [vmem:[%s695_s24 + $0x8] sm:$0xf] }
  0x12   : > { %599 = vmatprep.subr.bf16.mxu0 %v637_v0  ;;  %v284_v17 = vsel %vm282_vm3, %v559_v16, 0  ;;  %v620_v35 = vld [vmem:[%s695_s24 + $0x8] ss:$0 sps:$4 sm:$0xff]  }
  0x13   : > { %588 = vmatpush3.bf16.msra.mxu1 %v284_v17 }
  0x14   : > { %593 = vmatprep.subr.bf16.mxu1 %v637_v0 }
  0x15   : > { %335 = vrot.lane.b32.xlu1 %v619_v10, %s639_s21 }
  0x18   : > { %584 = vmatmul.mubr.msk.bf16.vlgmr.msra.gmra.mxu0 %vm219_vm1, %v216_v3 }
  0x19   : > { %601 = vmatprep.mubr.msk.bf16.mxu0 %vm638_vm0, %v637_v0 }
  0x83   : > { %v341_v20 = vpop.permute.xlu1 %340 }
  0x84   : > { %v346_v22 = vsel %vm219_vm1, %v341_v20, 0 }
  0x87   : > { %v336_v24 = vpop.permute.xlu1 %335 }
  0xd8   : > { %v260_v4 = vpop.f32.mrf.mxu0 }
  0xd9   : > { %v267_v5 = vsel %vm266_vm2, %v260_v4, -inf }
  0xda   : > { %268 = vmax.xlane.f32.xlu0 %v267_v5  ;;  %v585_v6 = vpop.f32.mrf.mxu0 }
  0xdc   : > { %v263_v7 = vpop.f32.mrf.mxu0 }
  0xde   : > { %v586_v8 = vpop.f32.mrf.mxu0 }
 0x163   : > { %v269_v11 = vpop.xlane.xlu0 %268 }
 0x164   : > { %v270_v12 = vsub.f32 %v260_v4, %v269_v11 }
 0x166   : > { %v271_v13 = vmul.f32 1.442695, %v270_v12 }
 0x168   : > { %621 = vpow2.f32 %v271_v13 }
 0x175   : > { %v622_v14 = vpop.eup %621 }
 0x176   : > { %v273_v15 = vsel %vm266_vm2, %v622_v14, 0.0 }
 0x177   : > { %274 = vadd.xlane.f32.xlu0 %v273_v15 }
 0x200   : > { %v275_v18 = vpop.xlane.xlu0 %274 }
 0x201   : > { %623 = vrcp.f32 %v275_v18 }
 0x20e   : > { %v624_v19 = vpop.eup %623 }
 0x20f   : > { %v277_v21 = vmul.f32 %v624_v19, %v622_v14 }
 0x211   : > { %v278_v23 = vpack.c.bf16 %v277_v21, %v277_v21 }
 0x213   : > { %590 = vmatmul.mubr.msk.bf16.vlgmr.msra.gmra.mxu1 %vm266_vm2, %v278_v23 }
 0x214   : > { %594 = vmatpush3.bf16.xpose.msra.mxu1 %v346_v22  ;;  %595 = vmatprep.mubr.msk.bf16.mxu1 %vm638_vm0, %v637_v0 }
 0x21b   : > { %596 = vmatmul.mubr.msk.bf16.vlgmr.msra.gmra.mxu1 %vm219_vm1, %v336_v24 }
 0x2d3   : > { %v320_v25 = vpop.f32.mrf.mxu1 }
 0x2d4   : > { %v326_v26 = vpack.c.bf16 %v320_v25, %v320_v25 }
 0x2d5   : > { %v591_v27 = vpop.f32.mrf.mxu1 }
 0x2d6   : > { %328 = vst.msk [vmem:[%s707_s28] sm:$0xf] %vm327_vm4, %v326_v26 }
 0x2d7   : > { %v323_v28 = vpop.f32.mrf.mxu1 }
 0x2d9   : > { %v592_v29 = vpop.f32.mrf.mxu1 }
 0x2db   : > { %v382_v30 = vpop.f32.mrf.mxu1 }
 0x2dc   : > { %v388_v31 = vsel %vm266_vm2, %v382_v30, -inf }
 0x2dd   : > { %389 = vmax.xlane.f32.xlu0 %v388_v31  ;;  %v597_v32 = vpop.f32.mrf.mxu1 }
 0x2df   : > { %v385_v33 = vpop.f32.mrf.mxu1 }
 0x2e1   : > { %v598_v34 = vpop.f32.mrf.mxu1 }
 0x2f3   : > { %403 = vrot.lane.b32.xlu0 %v620_v35, %s639_s21 }
 0x366   : > { %v390_v36 = vpop.xlane.xlu0 %389 }
 0x367   : > { %v391_v37 = vsub.f32 %v382_v30, %v390_v36 }
 0x369   : > { %v392_v38 = vmul.f32 1.442695, %v391_v37 }
 0x36a   : > { %v404_v41 = vpop.permute.xlu0 %403 }
 0x36b   : > { %625 = vpow2.f32 %v392_v38  ;;  %v409_v42 = vsel %vm282_vm3, %v404_v41, 0 }
 0x36c   : > { %600 = vmatpush3.bf16.msra.mxu0 %v409_v42 }
 0x378   : > { %v626_v39 = vpop.eup %625 }
 0x379   : > { %v394_v40 = vsel %vm266_vm2, %v626_v39, 0.0 }
 0x37a   : > { %395 = vadd.xlane.f32.xlu1 %v394_v40 }
 0x403   : > { %v396_v43 = vpop.xlane.xlu1 %395 }
 0x404   : > { %627 = vrcp.f32 %v396_v43 }
 0x411   : > { %v628_v44 = vpop.eup %627 }
 0x412   : > { %v398_v45 = vmul.f32 %v628_v44, %v626_v39 }
 0x414   : > { %v399_v46 = vpack.c.bf16 %v398_v45, %v398_v45 }
 0x416   : > { %602 = vmatmul.mubr.msk.bf16.vlgmr.msra.gmra.mxu0 %vm266_vm2, %v399_v46 }
 0x4d6   : > { %v445_v47 = vpop.f32.mrf.mxu0 }
 0x4d7   : > { %v572_v48 = vpack.c.bf16 %v445_v47, %v445_v47 }
 0x4d8   : > { %v603_v49 = vpop.f32.mrf.mxu0 }
 0x4d9   : > { %455 = vrot.lane.b32.xlu0 %v572_v48, %s640_s29 }
 0x4da   : > { %v448_v50 = vpop.f32.mrf.mxu0 }
 0x4dc   : > { %v604_v51 = vpop.f32.mrf.mxu0 }
 0x54b   : > { %v456_v52 = vpop.permute.xlu0 %455 }
 0x54c   : > { %459 = vst.msk [vmem:[%s707_s28] sm:$0xf] %vm458_vm5, %v456_v52 }
 0x54d PF: > { %s13_s12 = sadd.s32 1, %s635_s12  }
 0x54e   : > { %p10_p4 = scmp.ge.s32.totalorder %s13_s12, 4  }
 0x550   :  { %12 = sbr.rel (!%p10_p4) target bundleno = 1 (0x1), region = 68 }

// kernel: _vit_layer_forward.8
= control target key start
LH: loop header
LB: loop body
LE: loop exit
PB: predicated region body
PF: predicated region fallthrough
CT: control target
= control target key end

     0   :  { %s639_s18 = smov 0   ;;  %s641_s19 = smov 0   ;;  %s697_s0 = inlined_call_operand.vmem [shape: bf16[16,32], index: 0, kind: input, shape index: {}]   ;;  %s698_s1 = inlined_call_operand.vmem [shape: bf16[32,128], index: 1, kind: input, shape index: {}]   ;;  %s699_s2 = inlined_call_operand.vmem [shape: bf16[1,128], index: 2, kind: input, shape index: {}]   ;;  %s700_s3 = inlined_call_operand.vmem [shape: f32[1,32], index: 3, kind: input, shape index: {}]   ;;  %s701_s4 = inlined_call_operand.vmem [shape: f32[1,32], index: 4, kind: input, shape index: {}]   ;;  %s702_s5 = inlined_call_operand.vmem [shape: bf16[16,128], index: 5, kind: output, shape index: {}]  }
   0x1   :  { %s643_s20 = smov 0  }
   0x2 LB: > { %s34_s21 = sadd.s32 1, %s601_s19  ;;  %p530_p0 = scmp.ge.s32.totalorder %s605_s20, 1  ;;  %s605_s20 = sphi %s643_s20, %s15_s20   ;;  %s601_s19 = sphi %s641_s19, %s704_s19   ;;  %s597_s18 = sphi %s639_s18, %s703_s18  }
   0x3   : > { %p36_p1 = scmp.ge.s32.totalorder %s34_s21, 2  ;;  %p236_p2 = scmp.lt.s32.totalorder %s605_s20, 3 }
   0x5   : > { %s706_s21 = smov (%p36_p1, %s34_s21), 0  ;;  %p237_p3 = pnand %p530_p0, %p236_p2 }
   0x6   : > { %p279_p4 = scmp.lt.s32.totalorder (!%p237_p3), %s597_s18, 1 }
   0x7   : > { %240 = sbr.rel (%p237_p3) target bundleno = 556 (0x22c), region = 40 }
   0xc   : > { %s708_s18 = smov (!%p279_p4, %s597_s18), 1  ;;  %vm308_vm0 = vcmask 261120   ;;  %v577_v8 = vld [vmem:[%s698_s1 + $0x8] sm:$0xff]   ;;  %v607_v9 = vmov 0.0   ;;  %vm608_vm1 = vmmov 0   ;;  %v578_v10 = vld [vmem:[%s698_s1] sm:$0xff]   ;;  %v346_v21 = vlaneseq }
   0xd   : > { %s531_s22 = sshll.u32 %s708_s18, 2  ;;  %543 = vmatprep.subr.bf16.mxu0 %v607_v9  ;;  %547 = vmatprep.mubr.msk.bf16.mxu0 %vm608_vm1, %v607_v9  ;;  %v533_v15 = vld [vmem:[%s700_s3] ss:$0 sm:$0xff] }
   0xe   : > { %s285_s25 = scalar_lea.vmem %s697_s0, %s531_s22  ;;  %544 = vmatpush3.bf16.msra.mxu0 %v577_v8  ;;  %v534_v17 = vld [vmem:[%s701_s4] ss:$0 sm:$0xff]  ;;  %v347_v22 = vshrl.u32 %v346_v21, 7  ;;  %s304_s13 = scalar_lea.vmem %s702_s5, %s531_s22 }
   0xf   : > { %v306_v0 = vld [vmem:[%s285_s25] sm:$0xf]  ;;  %545 = vmatprep.subr.bf16.mxu0 %v607_v9 }
  0x10   : > { %v307_v1 = vunpack.c.l.bf16 %v306_v0  ;;  %v344_v23 = vld [vmem:[%s699_s2] sm:$0x1]  ;;  %v348_v25 = vsub.s32 0, %v347_v22 }
  0x11   : > { %v345_v24 = vunpack.c.l.bf16 %v344_v23 }
  0x12   : > { %v309_v2 = vsel %vm308_vm0, %v307_v1, 0.0  ;;  %546 = vmatpush3.bf16.msra.mxu0 %v578_v10 }
  0x13   : > { %310 = vadd.xlane.f32.xlu0 %v309_v2  ;;  %v349_v26 = vrot.slane %v345_v24, %v348_v25 }
  0x9c   : > { %v311_v3 = vpop.xlane.xlu0 %310 }
  0x9d   : > { %v313_v4 = vmul.f32 0.03125, %v311_v3 }
  0x9f   : > { %v314_v5 = vsub.f32 %v307_v1, %v313_v4 }
  0xa1   : > { %v315_v6 = vmul.f32 %v314_v5, %v314_v5 }
  0xa3   : > { %v316_v7 = vsel %vm308_vm0, %v315_v6, 0.0 }
  0xa4   : > { %317 = vadd.xlane.f32.xlu0 %v316_v7 }
 0x12d   : > { %v318_v11 = vpop.xlane.xlu0 %317 }
 0x12e   : > { %v319_v12 = vmul.f32 0.03125, %v318_v11 }
 0x130   : > { %v320_v13 = vadd.f32 1e-12, %v319_v12 }
 0x132   : > { %579 = vrsqrt.f32 %v320_v13 }
 0x13f   : > { %v580_v14 = vpop.eup %579 }
 0x140   : > { %v322_v16 = vmul.f32 %v580_v14, %v314_v5 }
 0x142   : > { %v330_v18 = vmul.f32 %v533_v15, %v322_v16 }
 0x144   : > { %v338_v19 = vadd.f32 %v534_v17, %v330_v18 }
 0x146   : > { %v339_v20 = vpack.c.bf16 %v338_v19, %v338_v19 }
 0x148   : > { %548 = vmatmul.mubr.msk.bf16.vlgmr.msra.gmra.mxu0 %vm308_vm0, %v339_v20 }
 0x208   : > { %v399_v27 = vpop.f32.mrf.mxu0 }
 0x209   : > { %v400_v28 = vadd.f32 %v399_v27, %v349_v26 }
 0x20a   : > { %v549_v29 = vpop.f32.mrf.mxu0 }
 0x20b   : > { %v405_v30 = vmul.f32 %v400_v28, %v400_v28 }
 0x20c   : > { %v402_v31 = vpop.f32.mrf.mxu0 }
 0x20d   : > { %v406_v32 = vmul.f32 %v405_v30, %v400_v28 }
 0x20e   : > { %v550_v33 = vpop.f32.mrf.mxu0 }
 0x20f   : > { %v407_v34 = vmul.f32 0.044715, %v406_v32 }
 0x211   : > { %v408_v35 = vadd.f32 %v407_v34, %v400_v28 }
 0x213   : > { %v409_v36 = vmul.f32 0.7978846, %v408_v35 }
 0x215   : > { %581 = vtanh.f32 %v409_v36 }
 0x222   : > { %v582_v37 = vpop.eup %581 }
 0x223   : > { %v411_v38 = vadd.f32 1.0, %v582_v37 }
 0x225   : > { %v412_v39 = vmul.f32 0.5, %v411_v38 }
 0x227   : > { %v413_v40 = vmul.f32 %v412_v39, %v400_v28 }
 0x229   : > { %v414_v41 = vpack.c.bf16 %v413_v40, %v413_v40 }
 0x22b   : > { %415 = vst [vmem:[%s304_s13] sm:$0xf] %v414_v41 }
 0x22c PF: > { %s15_s20 = sadd.s32 1, %s605_s20   ;;  %s703_s18 = smov %s601_s19 }
 0x22d   : > { %p12_p5 = scmp.ge.s32.totalorder %s15_s20, 4   ;;  %s704_s19 = smov %s706_s21 }
 0x22f   :  { %14 = sbr.rel (!%p12_p5) target bundleno = 2 (0x2), region = 76 }

// kernel: _vit_layer_forward.9
= control target key start
LH: loop header
LB: loop body
LE: loop exit
PB: predicated region body
PF: predicated region fallthrough
CT: control target
= control target key end

     0   :  { %s680_s15 = smov 0   ;;  %s682_s16 = smov 0   ;;  %s747_s0 = inlined_call_operand.vmem [shape: bf16[16,128], index: 0, kind: input, shape index: {}]   ;;  %s748_s1 = inlined_call_operand.vmem [shape: bf16[128,128], index: 1, kind: input, shape index: {}]   ;;  %s749_s2 = inlined_call_operand.vmem [shape: bf16[1,128], index: 2, kind: input, shape index: {}]   ;;  %s750_s3 = inlined_call_operand.vmem [shape: bf16[16,128], index: 3, kind: input, shape index: {}]   ;;  %s751_s4 = inlined_call_operand.vmem [shape: bf16[16,128], index: 4, kind: output, shape index: {}]  }
   0x1   :  { %s684_s17 = smov 0  }
   0x2 LB: > { %s33_s18 = sadd.s32 1, %s647_s16  ;;  %p552_p0 = scmp.ge.s32.totalorder %s651_s17, 1  ;;  %s651_s17 = sphi %s684_s17, %s14_s17   ;;  %s647_s16 = sphi %s682_s16, %s753_s16   ;;  %s643_s15 = sphi %s680_s15, %s752_s15  }
   0x3   : > { %p35_p1 = scmp.ge.s32.totalorder %s33_s18, 2  ;;  %p225_p2 = scmp.lt.s32.totalorder %s651_s17, 3 }
   0x5   : > { %s755_s18 = smov (%p35_p1, %s33_s18), 0  ;;  %p226_p3 = pnand %p552_p0, %p225_p2 }
   0x6   : > { %p273_p4 = scmp.lt.s32.totalorder (!%p226_p3), %s643_s15, 1 }
   0x7   : > { %229 = sbr.rel (%p226_p3) target bundleno = 245 (0xf5), region = 36 }
   0xc   : > { %v621_v0 = vld [vmem:[%s748_s1 + $0x38] sm:$0xff]   ;;  %v653_v1 = vmov 0.0   ;;  %v622_v2 = vld [vmem:[%s748_s1 + $0x30] sm:$0xff]   ;;  %vm654_vm0 = vmmov 0   ;;  %v623_v3 = vld [vmem:[%s748_s1 + $0x28] sm:$0xff]   ;;  %s757_s15 = smov (!%p273_p4, %s643_s15), 1  ;;  %v326_v10 = vlaneseq }
   0xd   : > { %575 = vmatprep.subr.bf16.mxu0 %v653_v1  ;;  %591 = vmatprep.mubr.msk.bf16.mxu0 %vm654_vm0, %v653_v1  ;;  %v624_v4 = vld [vmem:[%s748_s1 + $0x20] sm:$0xff]   ;;  %v625_v5 = vld [vmem:[%s748_s1 + $0x18] sm:$0xff]   ;;  %v626_v6 = vld [vmem:[%s748_s1 + $0x10] sm:$0xff]   ;;  %s553_s7 = sshll.u32 %s757_s15, 2 }
   0xe   : > { %576 = vmatpush3.bf16.msra.mxu0 %v621_v0  ;;  %v627_v7 = vld [vmem:[%s748_s1 + $0x8] sm:$0xff]   ;;  %v628_v8 = vld [vmem:[%s748_s1] sm:$0xff]   ;;  %s279_s12 = scalar_lea.vmem %s747_s0, %s553_s7  ;;  %v327_v11 = vshrl.u32 %v326_v10, 7  ;;  %s298_s20 = scalar_lea.vmem %s750_s3, %s553_s7 }
   0xf   : > { %577 = vmatprep.subr.bf16.mxu0 %v653_v1  ;;  %v307_v9 = vld [vmem:[%s279_s12] sm:$0xf]  ;;  %s305_s23 = scalar_lea.vmem %s751_s4, %s553_s7 }
  0x10   : > { %v324_v12 = vld [vmem:[%s749_s2] sm:$0x1]  ;;  %v328_v14 = vsub.s32 0, %v327_v11 }
  0x11   : > { %v325_v13 = vunpack.c.l.bf16 %v324_v12  ;;  %v418_v15 = vld [vmem:[%s298_s20] sm:$0xf] }
  0x12   : > { %578 = vmatpush3.bf16.msra.mxu0 %v622_v2  ;;  %v419_v17 = vunpack.c.l.bf16 %v418_v15 }
  0x13   : > { %579 = vmatprep.subr.bf16.mxu0 %v653_v1  ;;  %v329_v16 = vrot.slane %v325_v13, %v328_v14 }
  0x16   : > { %580 = vmatpush3.bf16.msra.mxu0 %v623_v3 }
  0x17   : > { %581 = vmatprep.subr.bf16.mxu0 %v653_v1 }
  0x1a   : > { %582 = vmatpush3.bf16.msra.mxu0 %v624_v4 }
  0x1b   : > { %583 = vmatprep.subr.bf16.mxu0 %v653_v1 }
  0x1e   : > { %584 = vmatpush3.bf16.msra.mxu0 %v625_v5 }
  0x1f   : > { %585 = vmatprep.subr.bf16.mxu0 %v653_v1 }
  0x22   : > { %586 = vmatpush3.bf16.msra.mxu0 %v626_v6 }
  0x23   : > { %587 = vmatprep.subr.bf16.mxu0 %v653_v1 }
  0x26   : > { %588 = vmatpush3.bf16.msra.mxu0 %v627_v7 }
  0x27   : > { %589 = vmatprep.subr.bf16.mxu0 %v653_v1 }
  0x2a   : > { %590 = vmatpush3.bf16.msra.mxu0 %v628_v8 }
  0x2d   : > { %592 = vmatmul.mubr.bf16.vlgmr.msra.gmra.mxu0 %v307_v9 }
  0xed   : > { %v412_v18 = vpop.f32.mrf.mxu0 }
  0xee   : > { %v413_v19 = vadd.f32 %v412_v18, %v329_v16 }
  0xef   : > { %v593_v20 = vpop.f32.mrf.mxu0 }
  0xf0   : > { %v420_v21 = vadd.f32 %v419_v17, %v413_v19 }
  0xf1   : > { %v415_v22 = vpop.f32.mrf.mxu0 }
  0xf2   : > { %v421_v23 = vpack.c.bf16 %v420_v21, %v420_v21 }
  0xf3   : > { %v594_v24 = vpop.f32.mrf.mxu0 }
  0xf4   : > { %422 = vst [vmem:[%s305_s23] sm:$0xf] %v421_v23 }
  0xf5 PF: > { %s14_s17 = sadd.s32 1, %s651_s17   ;;  %s752_s15 = smov %s647_s16 }
  0xf6   : > { %p11_p5 = scmp.ge.s32.totalorder %s14_s17, 4   ;;  %s753_s16 = smov %s755_s18 }
  0xf8   :  { %13 = sbr.rel (!%p11_p5) target bundleno = 2 (0x2), region = 75 }

</bundles_post_ra>
